<compile_context>
chip_gen: v6e
topology: v6e:2x2x1
jax: 0.10.0
libtpu: 0.0.40
codegen_flags: <defaults>
</compile_context>

<pallas_src>
import jax
import jax.numpy as jnp
from jax import lax
from jax.experimental import pallas as pl
from jax.experimental.pallas import tpu as pltpu

HIDDEN = 30          # real hidden size (PyTorch module)
HP = 32              # hidden padded per gate -> 4 * HP = 128 lanes = one vreg
GP = 4 * HP          # 128


def lstm_kernel(xpre0_ref, whh0_ref, w1_ref, b1_ref, wout_ref, out_ref,
                x1_ref):
    # xpre0_ref: (T, B, GP)   x_t @ W_ih^0 + b^0 (gates i,f,o,g; g cols pre-scaled by 2)
    # whh0_ref : (HP, GP)     layer-0 recurrent weights (padded, fused gates, g cols *2)
    # w1_ref   : (2*HP, GP)   layer-1 fused weights: rows [0:HP]=W_ih^1, [HP:2HP]=W_hh^1
    # b1_ref   : (B, GP)      layer-1 bias, pre-broadcast over batch (g cols *2)
    # wout_ref : (1, HP)      final Linear(30->1, no bias) weights (padded)
    # x1_ref   : (B, 2*HP)    VMEM scratch: combined [h0 | h1] operand for the fused dot
    T, B, _ = xpre0_ref.shape

    whh0 = whh0_ref[...]
    w1 = w1_ref[...]
    b1 = b1_ref[...]

    def activate(pre):
        # Single EUP sigmoid over the whole (B, 128) gate slab.  g-gate inputs
        # were pre-scaled by 2 in the wrapper, so tanh(x) = 2*sigmoid(2x) - 1
        # is recovered with one VPU fma.  All slices are 32-lane aligned.
        s = jax.nn.sigmoid(pre)
        i = s[:, :HP]
        f = s[:, HP:2 * HP]
        o = s[:, 2 * HP:3 * HP]
        g = 2.0 * s[:, 3 * HP:] - 1.0
        return i, f, o, g

    # Combined layer-1 operand [h0 | h1]; zero initial state.
    x1_ref[...] = jnp.zeros_like(x1_ref)

    def step(t, carry):
        h0, c0, h1, c1 = carry
        # ---- layer 0 (input projection + bias precomputed in the wrapper) ----
        pre0 = xpre0_ref[t] + jnp.dot(h0, whh0,
                                      preferred_element_type=jnp.float32)
        i0, f0, o0, g0 = activate(pre0)
        c0 = f0 * c0 + i0 * g0
        h0 = o0 * jnp.tanh(c0)
        # ---- layer 1: one fused MXU dot over [h0_new | h1_prev] ----
        # TODO(synk): PyTorch applies dropout(p=0.5) to h0 between layers in
        # training mode; eval-mode forward (no dropout) is implemented here.
        x1_ref[:, HP:] = h1          # independent of layer-0 work; hoistable
        x1_ref[:, :HP] = h0
        pre1 = jnp.dot(x1_ref[...], w1,
                       preferred_element_type=jnp.float32) + b1
        i1, f1, o1, g1 = activate(pre1)
        c1 = f1 * c1 + i1 * g1
        h1 = o1 * jnp.tanh(c1)
        return h0, c0, h1, c1

    zeros = jnp.zeros((B, HP), jnp.float32)
    # Full unroll for short sequences; cap for long ones (compile time / imem).
    unroll = True if T <= 32 else 8
    h0, c0, h1, c1 = lax.fori_loop(0, T, step, (zeros, zeros, zeros, zeros),
                                   unroll=unroll)

    # relu -> Linear(30->1, bias=False) -> sigmoid, as VPU mul + lane reduce
    logits = jnp.sum(jnp.maximum(h1, 0.0) * wout_ref[...],
                     axis=-1, keepdims=True)
    out_ref[...] = jax.nn.sigmoid(logits)


# ---------------- weight packing (PyTorch layout -> fused/padded) -------------
def _pack_w(w, in_dim_pad, g_scale=2.0):
    # w: (4H, in) PyTorch layout, gates stacked (i, f, g, o) along rows.
    # Returns (in_dim_pad, GP): gate order (i, f, o, g), each gate block padded
    # from H to HP lanes; padded rows/lanes are zero.  The g block is scaled by
    # g_scale so the kernel can use tanh(x) = 2*sigmoid(2x) - 1.
    H = HIDDEN
    out = jnp.zeros((in_dim_pad, GP), jnp.float32)
    scales = (1.0, 1.0, 1.0, g_scale)
    for dst, src in enumerate((0, 1, 3, 2)):          # i, f, o, g
        blk = w[src * H:(src + 1) * H].T * scales[dst]     # (in, H)
        out = out.at[:blk.shape[0], dst * HP:dst * HP + H].set(blk)
    return out


def _pack_b(b, g_scale=2.0):
    H = HIDDEN
    out = jnp.zeros((1, GP), jnp.float32)
    scales = (1.0, 1.0, 1.0, g_scale)
    for dst, src in enumerate((0, 1, 3, 2)):
        out = out.at[0, dst * HP:dst * HP + H].set(
            b[src * H:(src + 1) * H] * scales[dst])
    return out


@jax.jit
def net_forward(x, p):
    # x: (B, 1, T) -> permute(2, 0, 1) -> (T, B, 1), eval-mode forward
    xt = jnp.transpose(x, (2, 0, 1)).astype(jnp.float32)
    T, B, _ = xt.shape

    wih0 = _pack_w(p["w_ih0"], 1)                     # (1, GP)
    whh0 = _pack_w(p["w_hh0"], HP)                    # (HP, GP)
    # Fused layer-1 weight: rows 0:HP multiply h0 (input), rows HP:2HP multiply h1.
    w1 = jnp.concatenate([_pack_w(p["w_ih1"], HP),
                          _pack_w(p["w_hh1"], HP)], axis=0)   # (2*HP, GP)
    b0 = _pack_b(p["b_ih0"] + p["b_hh0"])                     # (1, GP)
    b1 = jnp.broadcast_to(_pack_b(p["b_ih1"] + p["b_hh1"]), (B, GP))
    wout = jnp.zeros((1, HP), jnp.float32).at[0, :HIDDEN].set(p["w_out"][0])

    # Layer-0 input projection (input_size == 1): one outer product for all T,
    # fused with the layer-0 bias.  Tiny (T, B, 128) array, computed once.
    xpre0 = xt @ wih0 + b0                                    # (T, B, GP)

    # Advisory cost so XLA schedules the wrapper ops around the kernel.
    flops = int(T) * 2 * int(B) * GP * (HP + 2 * HP)
    transcendentals = int(T) * int(B) * (2 * GP + 2 * HP)
    bytes_accessed = 4 * (int(T) * int(B) * GP + HP * GP + 2 * HP * GP
                          + int(B) * GP + HP + int(B))

    return pl.pallas_call(
        lstm_kernel,
        out_shape=jax.ShapeDtypeStruct((B, 1), jnp.float32),
        in_specs=[pl.BlockSpec(memory_space=pltpu.MemorySpace.VMEM)] * 5,
        out_specs=pl.BlockSpec(memory_space=pltpu.MemorySpace.VMEM),
        scratch_shapes=[pltpu.VMEM((B, 2 * HP), jnp.float32)],
        # TODO(synk): for very long sequences on v7x (64 MiB VMEM) tile the time
        # axis with a grid instead of holding all of xpre0 resident in VMEM.
        compiler_params=pltpu.CompilerParams(
            vmem_limit_bytes=48 * 1024 * 1024),
        cost_estimate=pl.CostEstimate(flops=flops,
                                      transcendentals=transcendentals,
                                      bytes_accessed=bytes_accessed),
    )(xpre0, whh0, w1, b1, wout)


# -------------------------- parameters & reference ---------------------------
def make_params(key):
    # PyTorch nn.LSTM / nn.Linear layouts, default uniform(-1/sqrt(H), 1/sqrt(H))
    H = HIDDEN
    k = 1.0 / jnp.sqrt(jnp.float32(H))
    keys = jax.random.split(key, 9)

    def u(kk, shape):
        return jax.random.uniform(kk, shape, jnp.float32, -k, k)

    return dict(
        w_ih0=u(keys[0], (4 * H, 1)),
        w_hh0=u(keys[1], (4 * H, H)),
        b_ih0=u(keys[2], (4 * H,)),
        b_hh0=u(keys[3], (4 * H,)),
        w_ih1=u(keys[4], (4 * H, H)),
        w_hh1=u(keys[5], (4 * H, H)),
        b_ih1=u(keys[6], (4 * H,)),
        b_hh1=u(keys[7], (4 * H,)),
        w_out=u(keys[8], (1, H)),        # Linear(30 -> 1, bias=False)
    )


def ref_forward(x, p):
    # Pure-JAX eval-mode reference using the PyTorch weight layout directly.
    xt = jnp.transpose(x, (2, 0, 1)).astype(jnp.float32)
    T, B, _ = xt.shape
    H = HIDDEN

    def cell(inp, h, c, w_ih, w_hh, b_ih, b_hh):
        g = inp @ w_ih.T + h @ w_hh.T + b_ih + b_hh     # (B, 4H), order i,f,g,o
        i = jax.nn.sigmoid(g[:, 0:H])
        f = jax.nn.sigmoid(g[:, H:2 * H])
        gg = jnp.tanh(g[:, 2 * H:3 * H])
        o = jax.nn.sigmoid(g[:, 3 * H:4 * H])
        c = f * c + i * gg
        h = o * jnp.tanh(c)
        return h, c

    h0 = c0 = h1 = c1 = jnp.zeros((B, H), jnp.float32)
    for t in range(T):
        h0, c0 = cell(xt[t], h0, c0, p["w_ih0"], p["w_hh0"],
                      p["b_ih0"], p["b_hh0"])
        h1, c1 = cell(h0, h1, c1, p["w_ih1"], p["w_hh1"],
                      p["b_ih1"], p["b_hh1"])
    return jax.nn.sigmoid(jnp.maximum(h1, 0.0) @ p["w_out"].T)


if __name__ == "__main__":
    key = jax.random.PRNGKey(0)
    kp, kx = jax.random.split(key)
    params = make_params(kp)

    B, T = 2, 8
    x = jax.random.normal(kx, (B, 1, T), jnp.float32)   # (batch, features=1, seq)

    out = jax.block_until_ready(net_forward(x, params))
    ref = ref_forward(x, params)

    assert out.shape == (B, 1)
    assert jnp.allclose(out, ref, atol=1e-4, rtol=1e-4), (out, ref)
    print("KERNEL_OK")
</pallas_src>

<mosaic_0001>
module attributes {stable_mosaic.version = 11 : i64} {
  func.func @lstm_kernel(%arg0: memref<8x2x128xf32, #tpu.memory_space<vmem>>, %arg1: memref<32x128xf32, #tpu.memory_space<vmem>>, %arg2: memref<64x128xf32, #tpu.memory_space<vmem>>, %arg3: memref<2x128xf32, #tpu.memory_space<vmem>>, %arg4: memref<1x32xf32, #tpu.memory_space<vmem>>, %arg5: memref<2x1xf32, #tpu.memory_space<vmem>>, %arg6: memref<2x64xf32, #tpu.memory_space<vmem>>) attributes {dimension_semantics = [], scalar_prefetch = 0 : i64, scratch_operands = 1 : i64, tpu.core_type = #tpu.core_type<tc>} {
    %c0 = arith.constant 0 : index
    %c0_0 = arith.constant 0 : index
    %0 = vector.load %arg1[%c0, %c0_0] : memref<32x128xf32, #tpu.memory_space<vmem>>, vector<32x128xf32>
    %c0_1 = arith.constant 0 : index
    %c0_2 = arith.constant 0 : index
    %1 = vector.load %arg2[%c0_1, %c0_2] : memref<64x128xf32, #tpu.memory_space<vmem>>, vector<64x128xf32>
    %c0_3 = arith.constant 0 : index
    %c0_4 = arith.constant 0 : index
    %2 = vector.load %arg3[%c0_3, %c0_4] : memref<2x128xf32, #tpu.memory_space<vmem>>, vector<2x128xf32>
    %cst = arith.constant 0.000000e+00 : f32
    %3 = vector.broadcast %cst : f32 to vector<2x64xf32>
    %c0_5 = arith.constant 0 : index
    %c0_6 = arith.constant 0 : index
    %4 = vector.load %arg6[%c0_5, %c0_6] : memref<2x64xf32, #tpu.memory_space<vmem>>, vector<2x64xf32>
    tpu.vector_store %arg6[%c0_5, %c0_6], %3 {strides = array<i32>} : memref<2x64xf32, #tpu.memory_space<vmem>>, vector<2x64xf32>,
    %cst_7 = arith.constant 0.000000e+00 : f32
    %5 = vector.broadcast %cst_7 : f32 to vector<2x32xf32>
    %c0_i32 = arith.constant 0 : i32
    %6 = arith.index_cast %c0_i32 : i32 to index
    %c0_8 = arith.constant 0 : index
    %c0_9 = arith.constant 0 : index
    %7 = vector.load %arg0[%6, %c0_8, %c0_9] : memref<8x2x128xf32, #tpu.memory_space<vmem>>, vector<1x2x128xf32>
    %8 = vector.shape_cast %7 : vector<1x2x128xf32> to vector<2x128xf32>
    %cst_10 = arith.constant dense<0.000000e+00> : vector<2x128xf32>
    %9 = tpu.matmul %5, %0, %cst_10 {dimension_numbers = #tpu.dot_dimension_numbers<[1], [0], [0], [1], [0, 0, 1, 1], [], []>} : vector<2x32xf32>, vector<32x128xf32>, vector<2x128xf32> -> vector<2x128xf32>
    %10 = arith.addf %8, %9 : vector<2x128xf32>
    %11 = arith.negf %10 : vector<2x128xf32>
    %12 = math.exp %11 : vector<2x128xf32>
    %cst_11 = arith.constant 1.000000e+00 : f32
    %13 = vector.broadcast %cst_11 : f32 to vector<2x128xf32>
    %14 = arith.addf %13, %12 : vector<2x128xf32>
    %15 = arith.divf %13, %14 : vector<2x128xf32>
    %16 = vector.extract_strided_slice %15 {offsets = [0, 0], sizes = [2, 32], strides = [1, 1]} : vector<2x128xf32> to vector<2x32xf32>
    %17 = vector.extract_strided_slice %15 {offsets = [0, 32], sizes = [2, 32], strides = [1, 1]} : vector<2x128xf32> to vector<2x32xf32>
    %18 = vector.extract_strided_slice %15 {offsets = [0, 64], sizes = [2, 32], strides = [1, 1]} : vector<2x128xf32> to vector<2x32xf32>
    %19 = vector.extract_strided_slice %15 {offsets = [0, 96], sizes = [2, 32], strides = [1, 1]} : vector<2x128xf32> to vector<2x32xf32>
    %cst_12 = arith.constant 2.000000e+00 : f32
    %20 = vector.broadcast %cst_12 : f32 to vector<2x32xf32>
    %21 = arith.mulf %20, %19 : vector<2x32xf32>
    %cst_13 = arith.constant 1.000000e+00 : f32
    %22 = vector.broadcast %cst_13 : f32 to vector<2x32xf32>
    %23 = arith.subf %21, %22 : vector<2x32xf32>
    %24 = arith.mulf %17, %5 : vector<2x32xf32>
    %25 = arith.mulf %16, %23 : vector<2x32xf32>
    %26 = arith.addf %24, %25 : vector<2x32xf32>
    %27 = math.tanh %26 : vector<2x32xf32>
    %28 = arith.mulf %18, %27 : vector<2x32xf32>
    %c0_14 = arith.constant 0 : index
    %c32 = arith.constant 32 : index
    %29 = vector.load %arg6[%c0_14, %c32] : memref<2x64xf32, #tpu.memory_space<vmem>>, vector<2x32xf32>
    tpu.vector_store %arg6[%c0_14, %c32], %5 {strides = array<i32>} : memref<2x64xf32, #tpu.memory_space<vmem>>, vector<2x32xf32>,
    %c0_15 = arith.constant 0 : index
    %c0_16 = arith.constant 0 : index
    %30 = vector.load %arg6[%c0_15, %c0_16] : memref<2x64xf32, #tpu.memory_space<vmem>>, vector<2x32xf32>
    tpu.vector_store %arg6[%c0_15, %c0_16], %28 {strides = array<i32>} : memref<2x64xf32, #tpu.memory_space<vmem>>, vector<2x32xf32>,
    %c0_17 = arith.constant 0 : index
    %c0_18 = arith.constant 0 : index
    %31 = vector.load %arg6[%c0_17, %c0_18] : memref<2x64xf32, #tpu.memory_space<vmem>>, vector<2x64xf32>
    %cst_19 = arith.constant dense<0.000000e+00> : vector<2x128xf32>
    %32 = tpu.matmul %31, %1, %cst_19 {dimension_numbers = #tpu.dot_dimension_numbers<[1], [0], [0], [1], [0, 0, 1, 1], [], []>} : vector<2x64xf32>, vector<64x128xf32>, vector<2x128xf32> -> vector<2x128xf32>
    %33 = arith.addf %32, %2 : vector<2x128xf32>
    %34 = arith.negf %33 : vector<2x128xf32>
    %35 = math.exp %34 : vector<2x128xf32>
    %cst_20 = arith.constant 1.000000e+00 : f32
    %36 = vector.broadcast %cst_20 : f32 to vector<2x128xf32>
    %37 = arith.addf %36, %35 : vector<2x128xf32>
    %38 = arith.divf %36, %37 : vector<2x128xf32>
    %39 = vector.extract_strided_slice %38 {offsets = [0, 0], sizes = [2, 32], strides = [1, 1]} : vector<2x128xf32> to vector<2x32xf32>
    %40 = vector.extract_strided_slice %38 {offsets = [0, 32], sizes = [2, 32], strides = [1, 1]} : vector<2x128xf32> to vector<2x32xf32>
    %41 = vector.extract_strided_slice %38 {offsets = [0, 64], sizes = [2, 32], strides = [1, 1]} : vector<2x128xf32> to vector<2x32xf32>
    %42 = vector.extract_strided_slice %38 {offsets = [0, 96], sizes = [2, 32], strides = [1, 1]} : vector<2x128xf32> to vector<2x32xf32>
    %cst_21 = arith.constant 2.000000e+00 : f32
    %43 = vector.broadcast %cst_21 : f32 to vector<2x32xf32>
    %44 = arith.mulf %43, %42 : vector<2x32xf32>
    %cst_22 = arith.constant 1.000000e+00 : f32
    %45 = vector.broadcast %cst_22 : f32 to vector<2x32xf32>
    %46 = arith.subf %44, %45 : vector<2x32xf32>
    %47 = arith.mulf %40, %5 : vector<2x32xf32>
    %48 = arith.mulf %39, %46 : vector<2x32xf32>
    %49 = arith.addf %47, %48 : vector<2x32xf32>
    %50 = math.tanh %49 : vector<2x32xf32>
    %51 = arith.mulf %41, %50 : vector<2x32xf32>
    %c1_i32 = arith.constant 1 : i32
    %52 = arith.index_cast %c1_i32 : i32 to index
    %c0_23 = arith.constant 0 : index
    %c0_24 = arith.constant 0 : index
    %53 = vector.load %arg0[%52, %c0_23, %c0_24] : memref<8x2x128xf32, #tpu.memory_space<vmem>>, vector<1x2x128xf32>
    %54 = vector.shape_cast %53 : vector<1x2x128xf32> to vector<2x128xf32>
    %cst_25 = arith.constant dense<0.000000e+00> : vector<2x128xf32>
    %55 = tpu.matmul %28, %0, %cst_25 {dimension_numbers = #tpu.dot_dimension_numbers<[1], [0], [0], [1], [0, 0, 1, 1], [], []>} : vector<2x32xf32>, vector<32x128xf32>, vector<2x128xf32> -> vector<2x128xf32>
    %56 = arith.addf %54, %55 : vector<2x128xf32>
    %57 = arith.negf %56 : vector<2x128xf32>
    %58 = math.exp %57 : vector<2x128xf32>
    %cst_26 = arith.constant 1.000000e+00 : f32
    %59 = vector.broadcast %cst_26 : f32 to vector<2x128xf32>
    %60 = arith.addf %59, %58 : vector<2x128xf32>
    %61 = arith.divf %59, %60 : vector<2x128xf32>
    %62 = vector.extract_strided_slice %61 {offsets = [0, 0], sizes = [2, 32], strides = [1, 1]} : vector<2x128xf32> to vector<2x32xf32>
    %63 = vector.extract_strided_slice %61 {offsets = [0, 32], sizes = [2, 32], strides = [1, 1]} : vector<2x128xf32> to vector<2x32xf32>
    %64 = vector.extract_strided_slice %61 {offsets = [0, 64], sizes = [2, 32], strides = [1, 1]} : vector<2x128xf32> to vector<2x32xf32>
    %65 = vector.extract_strided_slice %61 {offsets = [0, 96], sizes = [2, 32], strides = [1, 1]} : vector<2x128xf32> to vector<2x32xf32>
    %cst_27 = arith.constant 2.000000e+00 : f32
    %66 = vector.broadcast %cst_27 : f32 to vector<2x32xf32>
    %67 = arith.mulf %66, %65 : vector<2x32xf32>
    %cst_28 = arith.constant 1.000000e+00 : f32
    %68 = vector.broadcast %cst_28 : f32 to vector<2x32xf32>
    %69 = arith.subf %67, %68 : vector<2x32xf32>
    %70 = arith.mulf %63, %26 : vector<2x32xf32>
    %71 = arith.mulf %62, %69 : vector<2x32xf32>
    %72 = arith.addf %70, %71 : vector<2x32xf32>
    %73 = math.tanh %72 : vector<2x32xf32>
    %74 = arith.mulf %64, %73 : vector<2x32xf32>
    %c0_29 = arith.constant 0 : index
    %c32_30 = arith.constant 32 : index
    %75 = vector.load %arg6[%c0_29, %c32_30] : memref<2x64xf32, #tpu.memory_space<vmem>>, vector<2x32xf32>
    tpu.vector_store %arg6[%c0_29, %c32_30], %51 {strides = array<i32>} : memref<2x64xf32, #tpu.memory_space<vmem>>, vector<2x32xf32>,
    %c0_31 = arith.constant 0 : index
    %c0_32 = arith.constant 0 : index
    %76 = vector.load %arg6[%c0_31, %c0_32] : memref<2x64xf32, #tpu.memory_space<vmem>>, vector<2x32xf32>
    tpu.vector_store %arg6[%c0_31, %c0_32], %74 {strides = array<i32>} : memref<2x64xf32, #tpu.memory_space<vmem>>, vector<2x32xf32>,
    %c0_33 = arith.constant 0 : index
    %c0_34 = arith.constant 0 : index
    %77 = vector.load %arg6[%c0_33, %c0_34] : memref<2x64xf32, #tpu.memory_space<vmem>>, vector<2x64xf32>
    %cst_35 = arith.constant dense<0.000000e+00> : vector<2x128xf32>
    %78 = tpu.matmul %77, %1, %cst_35 {dimension_numbers = #tpu.dot_dimension_numbers<[1], [0], [0], [1], [0, 0, 1, 1], [], []>} : vector<2x64xf32>, vector<64x128xf32>, vector<2x128xf32> -> vector<2x128xf32>
    %79 = arith.addf %78, %2 : vector<2x128xf32>
    %80 = arith.negf %79 : vector<2x128xf32>
    %81 = math.exp %80 : vector<2x128xf32>
    %cst_36 = arith.constant 1.000000e+00 : f32
    %82 = vector.broadcast %cst_36 : f32 to vector<2x128xf32>
    %83 = arith.addf %82, %81 : vector<2x128xf32>
    %84 = arith.divf %82, %83 : vector<2x128xf32>
    %85 = vector.extract_strided_slice %84 {offsets = [0, 0], sizes = [2, 32], strides = [1, 1]} : vector<2x128xf32> to vector<2x32xf32>
    %86 = vector.extract_strided_slice %84 {offsets = [0, 32], sizes = [2, 32], strides = [1, 1]} : vector<2x128xf32> to vector<2x32xf32>
    %87 = vector.extract_strided_slice %84 {offsets = [0, 64], sizes = [2, 32], strides = [1, 1]} : vector<2x128xf32> to vector<2x32xf32>
    %88 = vector.extract_strided_slice %84 {offsets = [0, 96], sizes = [2, 32], strides = [1, 1]} : vector<2x128xf32> to vector<2x32xf32>
    %cst_37 = arith.constant 2.000000e+00 : f32
    %89 = vector.broadcast %cst_37 : f32 to vector<2x32xf32>
    %90 = arith.mulf %89, %88 : vector<2x32xf32>
    %cst_38 = arith.constant 1.000000e+00 : f32
    %91 = vector.broadcast %cst_38 : f32 to vector<2x32xf32>
    %92 = arith.subf %90, %91 : vector<2x32xf32>
    %93 = arith.mulf %86, %49 : vector<2x32xf32>
    %94 = arith.mulf %85, %92 : vector<2x32xf32>
    %95 = arith.addf %93, %94 : vector<2x32xf32>
    %96 = math.tanh %95 : vector<2x32xf32>
    %97 = arith.mulf %87, %96 : vector<2x32xf32>
    %c2_i32 = arith.constant 2 : i32
    %98 = arith.index_cast %c2_i32 : i32 to index
    %c0_39 = arith.constant 0 : index
    %c0_40 = arith.constant 0 : index
    %99 = vector.load %arg0[%98, %c0_39, %c0_40] : memref<8x2x128xf32, #tpu.memory_space<vmem>>, vector<1x2x128xf32>
    %100 = vector.shape_cast %99 : vector<1x2x128xf32> to vector<2x128xf32>
    %cst_41 = arith.constant dense<0.000000e+00> : vector<2x128xf32>
    %101 = tpu.matmul %74, %0, %cst_41 {dimension_numbers = #tpu.dot_dimension_numbers<[1], [0], [0], [1], [0, 0, 1, 1], [], []>} : vector<2x32xf32>, vector<32x128xf32>, vector<2x128xf32> -> vector<2x128xf32>
    %102 = arith.addf %100, %101 : vector<2x128xf32>
    %103 = arith.negf %102 : vector<2x128xf32>
    %104 = math.exp %103 : vector<2x128xf32>
    %cst_42 = arith.constant 1.000000e+00 : f32
    %105 = vector.broadcast %cst_42 : f32 to vector<2x128xf32>
    %106 = arith.addf %105, %104 : vector<2x128xf32>
    %107 = arith.divf %105, %106 : vector<2x128xf32>
    %108 = vector.extract_strided_slice %107 {offsets = [0, 0], sizes = [2, 32], strides = [1, 1]} : vector<2x128xf32> to vector<2x32xf32>
    %109 = vector.extract_strided_slice %107 {offsets = [0, 32], sizes = [2, 32], strides = [1, 1]} : vector<2x128xf32> to vector<2x32xf32>
    %110 = vector.extract_strided_slice %107 {offsets = [0, 64], sizes = [2, 32], strides = [1, 1]} : vector<2x128xf32> to vector<2x32xf32>
    %111 = vector.extract_strided_slice %107 {offsets = [0, 96], sizes = [2, 32], strides = [1, 1]} : vector<2x128xf32> to vector<2x32xf32>
    %cst_43 = arith.constant 2.000000e+00 : f32
    %112 = vector.broadcast %cst_43 : f32 to vector<2x32xf32>
    %113 = arith.mulf %112, %111 : vector<2x32xf32>
    %cst_44 = arith.constant 1.000000e+00 : f32
    %114 = vector.broadcast %cst_44 : f32 to vector<2x32xf32>
    %115 = arith.subf %113, %114 : vector<2x32xf32>
    %116 = arith.mulf %109, %72 : vector<2x32xf32>
    %117 = arith.mulf %108, %115 : vector<2x32xf32>
    %118 = arith.addf %116, %117 : vector<2x32xf32>
    %119 = math.tanh %118 : vector<2x32xf32>
    %120 = arith.mulf %110, %119 : vector<2x32xf32>
    %c0_45 = arith.constant 0 : index
    %c32_46 = arith.constant 32 : index
    %121 = vector.load %arg6[%c0_45, %c32_46] : memref<2x64xf32, #tpu.memory_space<vmem>>, vector<2x32xf32>
    tpu.vector_store %arg6[%c0_45, %c32_46], %97 {strides = array<i32>} : memref<2x64xf32, #tpu.memory_space<vmem>>, vector<2x32xf32>,
    %c0_47 = arith.constant 0 : index
    %c0_48 = arith.constant 0 : index
    %122 = vector.load %arg6[%c0_47, %c0_48] : memref<2x64xf32, #tpu.memory_space<vmem>>, vector<2x32xf32>
    tpu.vector_store %arg6[%c0_47, %c0_48], %120 {strides = array<i32>} : memref<2x64xf32, #tpu.memory_space<vmem>>, vector<2x32xf32>,
    %c0_49 = arith.constant 0 : index
    %c0_50 = arith.constant 0 : index
    %123 = vector.load %arg6[%c0_49, %c0_50] : memref<2x64xf32, #tpu.memory_space<vmem>>, vector<2x64xf32>
    %cst_51 = arith.constant dense<0.000000e+00> : vector<2x128xf32>
    %124 = tpu.matmul %123, %1, %cst_51 {dimension_numbers = #tpu.dot_dimension_numbers<[1], [0], [0], [1], [0, 0, 1, 1], [], []>} : vector<2x64xf32>, vector<64x128xf32>, vector<2x128xf32> -> vector<2x128xf32>
    %125 = arith.addf %124, %2 : vector<2x128xf32>
    %126 = arith.negf %125 : vector<2x128xf32>
    %127 = math.exp %126 : vector<2x128xf32>
    %cst_52 = arith.constant 1.000000e+00 : f32
    %128 = vector.broadcast %cst_52 : f32 to vector<2x128xf32>
    %129 = arith.addf %128, %127 : vector<2x128xf32>
    %130 = arith.divf %128, %129 : vector<2x128xf32>
    %131 = vector.extract_strided_slice %130 {offsets = [0, 0], sizes = [2, 32], strides = [1, 1]} : vector<2x128xf32> to vector<2x32xf32>
    %132 = vector.extract_strided_slice %130 {offsets = [0, 32], sizes = [2, 32], strides = [1, 1]} : vector<2x128xf32> to vector<2x32xf32>
    %133 = vector.extract_strided_slice %130 {offsets = [0, 64], sizes = [2, 32], strides = [1, 1]} : vector<2x128xf32> to vector<2x32xf32>
    %134 = vector.extract_strided_slice %130 {offsets = [0, 96], sizes = [2, 32], strides = [1, 1]} : vector<2x128xf32> to vector<2x32xf32>
    %cst_53 = arith.constant 2.000000e+00 : f32
    %135 = vector.broadcast %cst_53 : f32 to vector<2x32xf32>
    %136 = arith.mulf %135, %134 : vector<2x32xf32>
    %cst_54 = arith.constant 1.000000e+00 : f32
    %137 = vector.broadcast %cst_54 : f32 to vector<2x32xf32>
    %138 = arith.subf %136, %137 : vector<2x32xf32>
    %139 = arith.mulf %132, %95 : vector<2x32xf32>
    %140 = arith.mulf %131, %138 : vector<2x32xf32>
    %141 = arith.addf %139, %140 : vector<2x32xf32>
    %142 = math.tanh %141 : vector<2x32xf32>
    %143 = arith.mulf %133, %142 : vector<2x32xf32>
    %c3_i32 = arith.constant 3 : i32
    %144 = arith.index_cast %c3_i32 : i32 to index
    %c0_55 = arith.constant 0 : index
    %c0_56 = arith.constant 0 : index
    %145 = vector.load %arg0[%144, %c0_55, %c0_56] : memref<8x2x128xf32, #tpu.memory_space<vmem>>, vector<1x2x128xf32>
    %146 = vector.shape_cast %145 : vector<1x2x128xf32> to vector<2x128xf32>
    %cst_57 = arith.constant dense<0.000000e+00> : vector<2x128xf32>
    %147 = tpu.matmul %120, %0, %cst_57 {dimension_numbers = #tpu.dot_dimension_numbers<[1], [0], [0], [1], [0, 0, 1, 1], [], []>} : vector<2x32xf32>, vector<32x128xf32>, vector<2x128xf32> -> vector<2x128xf32>
    %148 = arith.addf %146, %147 : vector<2x128xf32>
    %149 = arith.negf %148 : vector<2x128xf32>
    %150 = math.exp %149 : vector<2x128xf32>
    %cst_58 = arith.constant 1.000000e+00 : f32
    %151 = vector.broadcast %cst_58 : f32 to vector<2x128xf32>
    %152 = arith.addf %151, %150 : vector<2x128xf32>
    %153 = arith.divf %151, %152 : vector<2x128xf32>
    %154 = vector.extract_strided_slice %153 {offsets = [0, 0], sizes = [2, 32], strides = [1, 1]} : vector<2x128xf32> to vector<2x32xf32>
    %155 = vector.extract_strided_slice %153 {offsets = [0, 32], sizes = [2, 32], strides = [1, 1]} : vector<2x128xf32> to vector<2x32xf32>
    %156 = vector.extract_strided_slice %153 {offsets = [0, 64], sizes = [2, 32], strides = [1, 1]} : vector<2x128xf32> to vector<2x32xf32>
    %157 = vector.extract_strided_slice %153 {offsets = [0, 96], sizes = [2, 32], strides = [1, 1]} : vector<2x128xf32> to vector<2x32xf32>
    %cst_59 = arith.constant 2.000000e+00 : f32
    %158 = vector.broadcast %cst_59 : f32 to vector<2x32xf32>
    %159 = arith.mulf %158, %157 : vector<2x32xf32>
    %cst_60 = arith.constant 1.000000e+00 : f32
    %160 = vector.broadcast %cst_60 : f32 to vector<2x32xf32>
    %161 = arith.subf %159, %160 : vector<2x32xf32>
    %162 = arith.mulf %155, %118 : vector<2x32xf32>
    %163 = arith.mulf %154, %161 : vector<2x32xf32>
    %164 = arith.addf %162, %163 : vector<2x32xf32>
    %165 = math.tanh %164 : vector<2x32xf32>
    %166 = arith.mulf %156, %165 : vector<2x32xf32>
    %c0_61 = arith.constant 0 : index
    %c32_62 = arith.constant 32 : index
    %167 = vector.load %arg6[%c0_61, %c32_62] : memref<2x64xf32, #tpu.memory_space<vmem>>, vector<2x32xf32>
    tpu.vector_store %arg6[%c0_61, %c32_62], %143 {strides = array<i32>} : memref<2x64xf32, #tpu.memory_space<vmem>>, vector<2x32xf32>,
    %c0_63 = arith.constant 0 : index
    %c0_64 = arith.constant 0 : index
    %168 = vector.load %arg6[%c0_63, %c0_64] : memref<2x64xf32, #tpu.memory_space<vmem>>, vector<2x32xf32>
    tpu.vector_store %arg6[%c0_63, %c0_64], %166 {strides = array<i32>} : memref<2x64xf32, #tpu.memory_space<vmem>>, vector<2x32xf32>,
    %c0_65 = arith.constant 0 : index
    %c0_66 = arith.constant 0 : index
    %169 = vector.load %arg6[%c0_65, %c0_66] : memref<2x64xf32, #tpu.memory_space<vmem>>, vector<2x64xf32>
    %cst_67 = arith.constant dense<0.000000e+00> : vector<2x128xf32>
    %170 = tpu.matmul %169, %1, %cst_67 {dimension_numbers = #tpu.dot_dimension_numbers<[1], [0], [0], [1], [0, 0, 1, 1], [], []>} : vector<2x64xf32>, vector<64x128xf32>, vector<2x128xf32> -> vector<2x128xf32>
    %171 = arith.addf %170, %2 : vector<2x128xf32>
    %172 = arith.negf %171 : vector<2x128xf32>
    %173 = math.exp %172 : vector<2x128xf32>
    %cst_68 = arith.constant 1.000000e+00 : f32
    %174 = vector.broadcast %cst_68 : f32 to vector<2x128xf32>
    %175 = arith.addf %174, %173 : vector<2x128xf32>
    %176 = arith.divf %174, %175 : vector<2x128xf32>
    %177 = vector.extract_strided_slice %176 {offsets = [0, 0], sizes = [2, 32], strides = [1, 1]} : vector<2x128xf32> to vector<2x32xf32>
    %178 = vector.extract_strided_slice %176 {offsets = [0, 32], sizes = [2, 32], strides = [1, 1]} : vector<2x128xf32> to vector<2x32xf32>
    %179 = vector.extract_strided_slice %176 {offsets = [0, 64], sizes = [2, 32], strides = [1, 1]} : vector<2x128xf32> to vector<2x32xf32>
    %180 = vector.extract_strided_slice %176 {offsets = [0, 96], sizes = [2, 32], strides = [1, 1]} : vector<2x128xf32> to vector<2x32xf32>
    %cst_69 = arith.constant 2.000000e+00 : f32
    %181 = vector.broadcast %cst_69 : f32 to vector<2x32xf32>
    %182 = arith.mulf %181, %180 : vector<2x32xf32>
    %cst_70 = arith.constant 1.000000e+00 : f32
    %183 = vector.broadcast %cst_70 : f32 to vector<2x32xf32>
    %184 = arith.subf %182, %183 : vector<2x32xf32>
    %185 = arith.mulf %178, %141 : vector<2x32xf32>
    %186 = arith.mulf %177, %184 : vector<2x32xf32>
    %187 = arith.addf %185, %186 : vector<2x32xf32>
    %188 = math.tanh %187 : vector<2x32xf32>
    %189 = arith.mulf %179, %188 : vector<2x32xf32>
    %c4_i32 = arith.constant 4 : i32
    %190 = arith.index_cast %c4_i32 : i32 to index
    %c0_71 = arith.constant 0 : index
    %c0_72 = arith.constant 0 : index
    %191 = vector.load %arg0[%190, %c0_71, %c0_72] : memref<8x2x128xf32, #tpu.memory_space<vmem>>, vector<1x2x128xf32>
    %192 = vector.shape_cast %191 : vector<1x2x128xf32> to vector<2x128xf32>
    %cst_73 = arith.constant dense<0.000000e+00> : vector<2x128xf32>
    %193 = tpu.matmul %166, %0, %cst_73 {dimension_numbers = #tpu.dot_dimension_numbers<[1], [0], [0], [1], [0, 0, 1, 1], [], []>} : vector<2x32xf32>, vector<32x128xf32>, vector<2x128xf32> -> vector<2x128xf32>
    %194 = arith.addf %192, %193 : vector<2x128xf32>
    %195 = arith.negf %194 : vector<2x128xf32>
    %196 = math.exp %195 : vector<2x128xf32>
    %cst_74 = arith.constant 1.000000e+00 : f32
    %197 = vector.broadcast %cst_74 : f32 to vector<2x128xf32>
    %198 = arith.addf %197, %196 : vector<2x128xf32>
    %199 = arith.divf %197, %198 : vector<2x128xf32>
    %200 = vector.extract_strided_slice %199 {offsets = [0, 0], sizes = [2, 32], strides = [1, 1]} : vector<2x128xf32> to vector<2x32xf32>
    %201 = vector.extract_strided_slice %199 {offsets = [0, 32], sizes = [2, 32], strides = [1, 1]} : vector<2x128xf32> to vector<2x32xf32>
    %202 = vector.extract_strided_slice %199 {offsets = [0, 64], sizes = [2, 32], strides = [1, 1]} : vector<2x128xf32> to vector<2x32xf32>
    %203 = vector.extract_strided_slice %199 {offsets = [0, 96], sizes = [2, 32], strides = [1, 1]} : vector<2x128xf32> to vector<2x32xf32>
    %cst_75 = arith.constant 2.000000e+00 : f32
    %204 = vector.broadcast %cst_75 : f32 to vector<2x32xf32>
    %205 = arith.mulf %204, %203 : vector<2x32xf32>
    %cst_76 = arith.constant 1.000000e+00 : f32
    %206 = vector.broadcast %cst_76 : f32 to vector<2x32xf32>
    %207 = arith.subf %205, %206 : vector<2x32xf32>
    %208 = arith.mulf %201, %164 : vector<2x32xf32>
    %209 = arith.mulf %200, %207 : vector<2x32xf32>
    %210 = arith.addf %208, %209 : vector<2x32xf32>
    %211 = math.tanh %210 : vector<2x32xf32>
    %212 = arith.mulf %202, %211 : vector<2x32xf32>
    %c0_77 = arith.constant 0 : index
    %c32_78 = arith.constant 32 : index
    %213 = vector.load %arg6[%c0_77, %c32_78] : memref<2x64xf32, #tpu.memory_space<vmem>>, vector<2x32xf32>
    tpu.vector_store %arg6[%c0_77, %c32_78], %189 {strides = array<i32>} : memref<2x64xf32, #tpu.memory_space<vmem>>, vector<2x32xf32>,
    %c0_79 = arith.constant 0 : index
    %c0_80 = arith.constant 0 : index
    %214 = vector.load %arg6[%c0_79, %c0_80] : memref<2x64xf32, #tpu.memory_space<vmem>>, vector<2x32xf32>
    tpu.vector_store %arg6[%c0_79, %c0_80], %212 {strides = array<i32>} : memref<2x64xf32, #tpu.memory_space<vmem>>, vector<2x32xf32>,
    %c0_81 = arith.constant 0 : index
    %c0_82 = arith.constant 0 : index
    %215 = vector.load %arg6[%c0_81, %c0_82] : memref<2x64xf32, #tpu.memory_space<vmem>>, vector<2x64xf32>
    %cst_83 = arith.constant dense<0.000000e+00> : vector<2x128xf32>
    %216 = tpu.matmul %215, %1, %cst_83 {dimension_numbers = #tpu.dot_dimension_numbers<[1], [0], [0], [1], [0, 0, 1, 1], [], []>} : vector<2x64xf32>, vector<64x128xf32>, vector<2x128xf32> -> vector<2x128xf32>
    %217 = arith.addf %216, %2 : vector<2x128xf32>
    %218 = arith.negf %217 : vector<2x128xf32>
    %219 = math.exp %218 : vector<2x128xf32>
    %cst_84 = arith.constant 1.000000e+00 : f32
    %220 = vector.broadcast %cst_84 : f32 to vector<2x128xf32>
    %221 = arith.addf %220, %219 : vector<2x128xf32>
    %222 = arith.divf %220, %221 : vector<2x128xf32>
    %223 = vector.extract_strided_slice %222 {offsets = [0, 0], sizes = [2, 32], strides = [1, 1]} : vector<2x128xf32> to vector<2x32xf32>
    %224 = vector.extract_strided_slice %222 {offsets = [0, 32], sizes = [2, 32], strides = [1, 1]} : vector<2x128xf32> to vector<2x32xf32>
    %225 = vector.extract_strided_slice %222 {offsets = [0, 64], sizes = [2, 32], strides = [1, 1]} : vector<2x128xf32> to vector<2x32xf32>
    %226 = vector.extract_strided_slice %222 {offsets = [0, 96], sizes = [2, 32], strides = [1, 1]} : vector<2x128xf32> to vector<2x32xf32>
    %cst_85 = arith.constant 2.000000e+00 : f32
    %227 = vector.broadcast %cst_85 : f32 to vector<2x32xf32>
    %228 = arith.mulf %227, %226 : vector<2x32xf32>
    %cst_86 = arith.constant 1.000000e+00 : f32
    %229 = vector.broadcast %cst_86 : f32 to vector<2x32xf32>
    %230 = arith.subf %228, %229 : vector<2x32xf32>
    %231 = arith.mulf %224, %187 : vector<2x32xf32>
    %232 = arith.mulf %223, %230 : vector<2x32xf32>
    %233 = arith.addf %231, %232 : vector<2x32xf32>
    %234 = math.tanh %233 : vector<2x32xf32>
    %235 = arith.mulf %225, %234 : vector<2x32xf32>
    %c5_i32 = arith.constant 5 : i32
    %236 = arith.index_cast %c5_i32 : i32 to index
    %c0_87 = arith.constant 0 : index
    %c0_88 = arith.constant 0 : index
    %237 = vector.load %arg0[%236, %c0_87, %c0_88] : memref<8x2x128xf32, #tpu.memory_space<vmem>>, vector<1x2x128xf32>
    %238 = vector.shape_cast %237 : vector<1x2x128xf32> to vector<2x128xf32>
    %cst_89 = arith.constant dense<0.000000e+00> : vector<2x128xf32>
    %239 = tpu.matmul %212, %0, %cst_89 {dimension_numbers = #tpu.dot_dimension_numbers<[1], [0], [0], [1], [0, 0, 1, 1], [], []>} : vector<2x32xf32>, vector<32x128xf32>, vector<2x128xf32> -> vector<2x128xf32>
    %240 = arith.addf %238, %239 : vector<2x128xf32>
    %241 = arith.negf %240 : vector<2x128xf32>
    %242 = math.exp %241 : vector<2x128xf32>
    %cst_90 = arith.constant 1.000000e+00 : f32
    %243 = vector.broadcast %cst_90 : f32 to vector<2x128xf32>
    %244 = arith.addf %243, %242 : vector<2x128xf32>
    %245 = arith.divf %243, %244 : vector<2x128xf32>
    %246 = vector.extract_strided_slice %245 {offsets = [0, 0], sizes = [2, 32], strides = [1, 1]} : vector<2x128xf32> to vector<2x32xf32>
    %247 = vector.extract_strided_slice %245 {offsets = [0, 32], sizes = [2, 32], strides = [1, 1]} : vector<2x128xf32> to vector<2x32xf32>
    %248 = vector.extract_strided_slice %245 {offsets = [0, 64], sizes = [2, 32], strides = [1, 1]} : vector<2x128xf32> to vector<2x32xf32>
    %249 = vector.extract_strided_slice %245 {offsets = [0, 96], sizes = [2, 32], strides = [1, 1]} : vector<2x128xf32> to vector<2x32xf32>
    %cst_91 = arith.constant 2.000000e+00 : f32
    %250 = vector.broadcast %cst_91 : f32 to vector<2x32xf32>
    %251 = arith.mulf %250, %249 : vector<2x32xf32>
    %cst_92 = arith.constant 1.000000e+00 : f32
    %252 = vector.broadcast %cst_92 : f32 to vector<2x32xf32>
    %253 = arith.subf %251, %252 : vector<2x32xf32>
    %254 = arith.mulf %247, %210 : vector<2x32xf32>
    %255 = arith.mulf %246, %253 : vector<2x32xf32>
    %256 = arith.addf %254, %255 : vector<2x32xf32>
    %257 = math.tanh %256 : vector<2x32xf32>
    %258 = arith.mulf %248, %257 : vector<2x32xf32>
    %c0_93 = arith.constant 0 : index
    %c32_94 = arith.constant 32 : index
    %259 = vector.load %arg6[%c0_93, %c32_94] : memref<2x64xf32, #tpu.memory_space<vmem>>, vector<2x32xf32>
    tpu.vector_store %arg6[%c0_93, %c32_94], %235 {strides = array<i32>} : memref<2x64xf32, #tpu.memory_space<vmem>>, vector<2x32xf32>,
    %c0_95 = arith.constant 0 : index
    %c0_96 = arith.constant 0 : index
    %260 = vector.load %arg6[%c0_95, %c0_96] : memref<2x64xf32, #tpu.memory_space<vmem>>, vector<2x32xf32>
    tpu.vector_store %arg6[%c0_95, %c0_96], %258 {strides = array<i32>} : memref<2x64xf32, #tpu.memory_space<vmem>>, vector<2x32xf32>,
    %c0_97 = arith.constant 0 : index
    %c0_98 = arith.constant 0 : index
    %261 = vector.load %arg6[%c0_97, %c0_98] : memref<2x64xf32, #tpu.memory_space<vmem>>, vector<2x64xf32>
    %cst_99 = arith.constant dense<0.000000e+00> : vector<2x128xf32>
    %262 = tpu.matmul %261, %1, %cst_99 {dimension_numbers = #tpu.dot_dimension_numbers<[1], [0], [0], [1], [0, 0, 1, 1], [], []>} : vector<2x64xf32>, vector<64x128xf32>, vector<2x128xf32> -> vector<2x128xf32>
    %263 = arith.addf %262, %2 : vector<2x128xf32>
    %264 = arith.negf %263 : vector<2x128xf32>
    %265 = math.exp %264 : vector<2x128xf32>
    %cst_100 = arith.constant 1.000000e+00 : f32
    %266 = vector.broadcast %cst_100 : f32 to vector<2x128xf32>
    %267 = arith.addf %266, %265 : vector<2x128xf32>
    %268 = arith.divf %266, %267 : vector<2x128xf32>
    %269 = vector.extract_strided_slice %268 {offsets = [0, 0], sizes = [2, 32], strides = [1, 1]} : vector<2x128xf32> to vector<2x32xf32>
    %270 = vector.extract_strided_slice %268 {offsets = [0, 32], sizes = [2, 32], strides = [1, 1]} : vector<2x128xf32> to vector<2x32xf32>
    %271 = vector.extract_strided_slice %268 {offsets = [0, 64], sizes = [2, 32], strides = [1, 1]} : vector<2x128xf32> to vector<2x32xf32>
    %272 = vector.extract_strided_slice %268 {offsets = [0, 96], sizes = [2, 32], strides = [1, 1]} : vector<2x128xf32> to vector<2x32xf32>
    %cst_101 = arith.constant 2.000000e+00 : f32
    %273 = vector.broadcast %cst_101 : f32 to vector<2x32xf32>
    %274 = arith.mulf %273, %272 : vector<2x32xf32>
    %cst_102 = arith.constant 1.000000e+00 : f32
    %275 = vector.broadcast %cst_102 : f32 to vector<2x32xf32>
    %276 = arith.subf %274, %275 : vector<2x32xf32>
    %277 = arith.mulf %270, %233 : vector<2x32xf32>
    %278 = arith.mulf %269, %276 : vector<2x32xf32>
    %279 = arith.addf %277, %278 : vector<2x32xf32>
    %280 = math.tanh %279 : vector<2x32xf32>
    %281 = arith.mulf %271, %280 : vector<2x32xf32>
    %c6_i32 = arith.constant 6 : i32
    %282 = arith.index_cast %c6_i32 : i32 to index
    %c0_103 = arith.constant 0 : index
    %c0_104 = arith.constant 0 : index
    %283 = vector.load %arg0[%282, %c0_103, %c0_104] : memref<8x2x128xf32, #tpu.memory_space<vmem>>, vector<1x2x128xf32>
    %284 = vector.shape_cast %283 : vector<1x2x128xf32> to vector<2x128xf32>
    %cst_105 = arith.constant dense<0.000000e+00> : vector<2x128xf32>
    %285 = tpu.matmul %258, %0, %cst_105 {dimension_numbers = #tpu.dot_dimension_numbers<[1], [0], [0], [1], [0, 0, 1, 1], [], []>} : vector<2x32xf32>, vector<32x128xf32>, vector<2x128xf32> -> vector<2x128xf32>
    %286 = arith.addf %284, %285 : vector<2x128xf32>
    %287 = arith.negf %286 : vector<2x128xf32>
    %288 = math.exp %287 : vector<2x128xf32>
    %cst_106 = arith.constant 1.000000e+00 : f32
    %289 = vector.broadcast %cst_106 : f32 to vector<2x128xf32>
    %290 = arith.addf %289, %288 : vector<2x128xf32>
    %291 = arith.divf %289, %290 : vector<2x128xf32>
    %292 = vector.extract_strided_slice %291 {offsets = [0, 0], sizes = [2, 32], strides = [1, 1]} : vector<2x128xf32> to vector<2x32xf32>
    %293 = vector.extract_strided_slice %291 {offsets = [0, 32], sizes = [2, 32], strides = [1, 1]} : vector<2x128xf32> to vector<2x32xf32>
    %294 = vector.extract_strided_slice %291 {offsets = [0, 64], sizes = [2, 32], strides = [1, 1]} : vector<2x128xf32> to vector<2x32xf32>
    %295 = vector.extract_strided_slice %291 {offsets = [0, 96], sizes = [2, 32], strides = [1, 1]} : vector<2x128xf32> to vector<2x32xf32>
    %cst_107 = arith.constant 2.000000e+00 : f32
    %296 = vector.broadcast %cst_107 : f32 to vector<2x32xf32>
    %297 = arith.mulf %296, %295 : vector<2x32xf32>
    %cst_108 = arith.constant 1.000000e+00 : f32
    %298 = vector.broadcast %cst_108 : f32 to vector<2x32xf32>
    %299 = arith.subf %297, %298 : vector<2x32xf32>
    %300 = arith.mulf %293, %256 : vector<2x32xf32>
    %301 = arith.mulf %292, %299 : vector<2x32xf32>
    %302 = arith.addf %300, %301 : vector<2x32xf32>
    %303 = math.tanh %302 : vector<2x32xf32>
    %304 = arith.mulf %294, %303 : vector<2x32xf32>
    %c0_109 = arith.constant 0 : index
    %c32_110 = arith.constant 32 : index
    %305 = vector.load %arg6[%c0_109, %c32_110] : memref<2x64xf32, #tpu.memory_space<vmem>>, vector<2x32xf32>
    tpu.vector_store %arg6[%c0_109, %c32_110], %281 {strides = array<i32>} : memref<2x64xf32, #tpu.memory_space<vmem>>, vector<2x32xf32>,
    %c0_111 = arith.constant 0 : index
    %c0_112 = arith.constant 0 : index
    %306 = vector.load %arg6[%c0_111, %c0_112] : memref<2x64xf32, #tpu.memory_space<vmem>>, vector<2x32xf32>
    tpu.vector_store %arg6[%c0_111, %c0_112], %304 {strides = array<i32>} : memref<2x64xf32, #tpu.memory_space<vmem>>, vector<2x32xf32>,
    %c0_113 = arith.constant 0 : index
    %c0_114 = arith.constant 0 : index
    %307 = vector.load %arg6[%c0_113, %c0_114] : memref<2x64xf32, #tpu.memory_space<vmem>>, vector<2x64xf32>
    %cst_115 = arith.constant dense<0.000000e+00> : vector<2x128xf32>
    %308 = tpu.matmul %307, %1, %cst_115 {dimension_numbers = #tpu.dot_dimension_numbers<[1], [0], [0], [1], [0, 0, 1, 1], [], []>} : vector<2x64xf32>, vector<64x128xf32>, vector<2x128xf32> -> vector<2x128xf32>
    %309 = arith.addf %308, %2 : vector<2x128xf32>
    %310 = arith.negf %309 : vector<2x128xf32>
    %311 = math.exp %310 : vector<2x128xf32>
    %cst_116 = arith.constant 1.000000e+00 : f32
    %312 = vector.broadcast %cst_116 : f32 to vector<2x128xf32>
    %313 = arith.addf %312, %311 : vector<2x128xf32>
    %314 = arith.divf %312, %313 : vector<2x128xf32>
    %315 = vector.extract_strided_slice %314 {offsets = [0, 0], sizes = [2, 32], strides = [1, 1]} : vector<2x128xf32> to vector<2x32xf32>
    %316 = vector.extract_strided_slice %314 {offsets = [0, 32], sizes = [2, 32], strides = [1, 1]} : vector<2x128xf32> to vector<2x32xf32>
    %317 = vector.extract_strided_slice %314 {offsets = [0, 64], sizes = [2, 32], strides = [1, 1]} : vector<2x128xf32> to vector<2x32xf32>
    %318 = vector.extract_strided_slice %314 {offsets = [0, 96], sizes = [2, 32], strides = [1, 1]} : vector<2x128xf32> to vector<2x32xf32>
    %cst_117 = arith.constant 2.000000e+00 : f32
    %319 = vector.broadcast %cst_117 : f32 to vector<2x32xf32>
    %320 = arith.mulf %319, %318 : vector<2x32xf32>
    %cst_118 = arith.constant 1.000000e+00 : f32
    %321 = vector.broadcast %cst_118 : f32 to vector<2x32xf32>
    %322 = arith.subf %320, %321 : vector<2x32xf32>
    %323 = arith.mulf %316, %279 : vector<2x32xf32>
    %324 = arith.mulf %315, %322 : vector<2x32xf32>
    %325 = arith.addf %323, %324 : vector<2x32xf32>
    %326 = math.tanh %325 : vector<2x32xf32>
    %327 = arith.mulf %317, %326 : vector<2x32xf32>
    %c7_i32 = arith.constant 7 : i32
    %328 = arith.index_cast %c7_i32 : i32 to index
    %c0_119 = arith.constant 0 : index
    %c0_120 = arith.constant 0 : index
    %329 = vector.load %arg0[%328, %c0_119, %c0_120] : memref<8x2x128xf32, #tpu.memory_space<vmem>>, vector<1x2x128xf32>
    %330 = vector.shape_cast %329 : vector<1x2x128xf32> to vector<2x128xf32>
    %cst_121 = arith.constant dense<0.000000e+00> : vector<2x128xf32>
    %331 = tpu.matmul %304, %0, %cst_121 {dimension_numbers = #tpu.dot_dimension_numbers<[1], [0], [0], [1], [0, 0, 1, 1], [], []>} : vector<2x32xf32>, vector<32x128xf32>, vector<2x128xf32> -> vector<2x128xf32>
    %332 = arith.addf %330, %331 : vector<2x128xf32>
    %333 = arith.negf %332 : vector<2x128xf32>
    %334 = math.exp %333 : vector<2x128xf32>
    %cst_122 = arith.constant 1.000000e+00 : f32
    %335 = vector.broadcast %cst_122 : f32 to vector<2x128xf32>
    %336 = arith.addf %335, %334 : vector<2x128xf32>
    %337 = arith.divf %335, %336 : vector<2x128xf32>
    %338 = vector.extract_strided_slice %337 {offsets = [0, 0], sizes = [2, 32], strides = [1, 1]} : vector<2x128xf32> to vector<2x32xf32>
    %339 = vector.extract_strided_slice %337 {offsets = [0, 32], sizes = [2, 32], strides = [1, 1]} : vector<2x128xf32> to vector<2x32xf32>
    %340 = vector.extract_strided_slice %337 {offsets = [0, 64], sizes = [2, 32], strides = [1, 1]} : vector<2x128xf32> to vector<2x32xf32>
    %341 = vector.extract_strided_slice %337 {offsets = [0, 96], sizes = [2, 32], strides = [1, 1]} : vector<2x128xf32> to vector<2x32xf32>
    %cst_123 = arith.constant 2.000000e+00 : f32
    %342 = vector.broadcast %cst_123 : f32 to vector<2x32xf32>
    %343 = arith.mulf %342, %341 : vector<2x32xf32>
    %cst_124 = arith.constant 1.000000e+00 : f32
    %344 = vector.broadcast %cst_124 : f32 to vector<2x32xf32>
    %345 = arith.subf %343, %344 : vector<2x32xf32>
    %346 = arith.mulf %339, %302 : vector<2x32xf32>
    %347 = arith.mulf %338, %345 : vector<2x32xf32>
    %348 = arith.addf %346, %347 : vector<2x32xf32>
    %349 = math.tanh %348 : vector<2x32xf32>
    %350 = arith.mulf %340, %349 : vector<2x32xf32>
    %c0_125 = arith.constant 0 : index
    %c32_126 = arith.constant 32 : index
    %351 = vector.load %arg6[%c0_125, %c32_126] : memref<2x64xf32, #tpu.memory_space<vmem>>, vector<2x32xf32>
    tpu.vector_store %arg6[%c0_125, %c32_126], %327 {strides = array<i32>} : memref<2x64xf32, #tpu.memory_space<vmem>>, vector<2x32xf32>,
    %c0_127 = arith.constant 0 : index
    %c0_128 = arith.constant 0 : index
    %352 = vector.load %arg6[%c0_127, %c0_128] : memref<2x64xf32, #tpu.memory_space<vmem>>, vector<2x32xf32>
    tpu.vector_store %arg6[%c0_127, %c0_128], %350 {strides = array<i32>} : memref<2x64xf32, #tpu.memory_space<vmem>>, vector<2x32xf32>,
    %c0_129 = arith.constant 0 : index
    %c0_130 = arith.constant 0 : index
    %353 = vector.load %arg6[%c0_129, %c0_130] : memref<2x64xf32, #tpu.memory_space<vmem>>, vector<2x64xf32>
    %cst_131 = arith.constant dense<0.000000e+00> : vector<2x128xf32>
    %354 = tpu.matmul %353, %1, %cst_131 {dimension_numbers = #tpu.dot_dimension_numbers<[1], [0], [0], [1], [0, 0, 1, 1], [], []>} : vector<2x64xf32>, vector<64x128xf32>, vector<2x128xf32> -> vector<2x128xf32>
    %355 = arith.addf %354, %2 : vector<2x128xf32>
    %356 = arith.negf %355 : vector<2x128xf32>
    %357 = math.exp %356 : vector<2x128xf32>
    %cst_132 = arith.constant 1.000000e+00 : f32
    %358 = vector.broadcast %cst_132 : f32 to vector<2x128xf32>
    %359 = arith.addf %358, %357 : vector<2x128xf32>
    %360 = arith.divf %358, %359 : vector<2x128xf32>
    %361 = vector.extract_strided_slice %360 {offsets = [0, 0], sizes = [2, 32], strides = [1, 1]} : vector<2x128xf32> to vector<2x32xf32>
    %362 = vector.extract_strided_slice %360 {offsets = [0, 32], sizes = [2, 32], strides = [1, 1]} : vector<2x128xf32> to vector<2x32xf32>
    %363 = vector.extract_strided_slice %360 {offsets = [0, 64], sizes = [2, 32], strides = [1, 1]} : vector<2x128xf32> to vector<2x32xf32>
    %364 = vector.extract_strided_slice %360 {offsets = [0, 96], sizes = [2, 32], strides = [1, 1]} : vector<2x128xf32> to vector<2x32xf32>
    %cst_133 = arith.constant 2.000000e+00 : f32
    %365 = vector.broadcast %cst_133 : f32 to vector<2x32xf32>
    %366 = arith.mulf %365, %364 : vector<2x32xf32>
    %cst_134 = arith.constant 1.000000e+00 : f32
    %367 = vector.broadcast %cst_134 : f32 to vector<2x32xf32>
    %368 = arith.subf %366, %367 : vector<2x32xf32>
    %369 = arith.mulf %362, %325 : vector<2x32xf32>
    %370 = arith.mulf %361, %368 : vector<2x32xf32>
    %371 = arith.addf %369, %370 : vector<2x32xf32>
    %372 = math.tanh %371 : vector<2x32xf32>
    %373 = arith.mulf %363, %372 : vector<2x32xf32>
    %c8_i32 = arith.constant 8 : i32
    %cst_135 = arith.constant 0.000000e+00 : f32
    %374 = vector.broadcast %cst_135 : f32 to vector<2x32xf32>
    %375 = arith.maximumf %373, %374 : vector<2x32xf32>
    %c0_136 = arith.constant 0 : index
    %c0_137 = arith.constant 0 : index
    %376 = vector.load %arg4[%c0_136, %c0_137] : memref<1x32xf32, #tpu.memory_space<vmem>>, vector<1x32xf32>
    %377 = vector.broadcast %376 : vector<1x32xf32> to vector<2x32xf32>
    %378 = arith.mulf %375, %377 : vector<2x32xf32>
    %cst_138 = arith.constant dense<0.000000e+00> : vector<2xf32>
    %379 = vector.multi_reduction <add>, %378, %cst_138 [1] : vector<2x32xf32> to vector<2xf32>
    %380 = vector.shape_cast %379 : vector<2xf32> to vector<2x1xf32>
    %381 = arith.negf %380 : vector<2x1xf32>
    %382 = math.exp %381 : vector<2x1xf32>
    %cst_139 = arith.constant 1.000000e+00 : f32
    %383 = vector.broadcast %cst_139 : f32 to vector<2x1xf32>
    %384 = arith.addf %383, %382 : vector<2x1xf32>
    %385 = arith.divf %383, %384 : vector<2x1xf32>
    %c0_140 = arith.constant 0 : index
    %c0_141 = arith.constant 0 : index
    %386 = vector.load %arg5[%c0_140, %c0_141] : memref<2x1xf32, #tpu.memory_space<vmem>>, vector<2x1xf32>
    tpu.vector_store %arg5[%c0_140, %c0_141], %385 {strides = array<i32>} : memref<2x1xf32, #tpu.memory_space<vmem>>, vector<2x1xf32>,
    return
  }
}

</mosaic_0001>

<bundles_post_ra>
// kernel: net_forward.1
= control target key start
LH: loop header
LB: loop body
LE: loop exit
PB: predicated region body
PF: predicated region fallthrough
CT: control target
= control target key end

     0   :  { %v2263_v0 = vmov 0.0   ;;  %vm2264_vm0 = vmmov 0   ;;  %s2265_s28 = smov 32   ;;  %vm33_vm1 = vcmask 517120   ;;  %vm136_vm2 = vcmask 517376   ;;  %s2266_s20 = smov 64   ;;  %s2803_s1 = inlined_call_operand.vmem [shape: f32[32,128], index: 1, kind: input, shape index: {}]   ;;  %s2804_s0 = inlined_call_operand.vmem [shape: f32[8,2,128], index: 0, kind: input, shape index: {}]   ;;  %s2805_s2 = inlined_call_operand.vmem [shape: f32[64,128], index: 2, kind: input, shape index: {}]   ;;  %s2806_s3 = inlined_call_operand.vmem [shape: f32[2,128], index: 3, kind: input, shape index: {}]   ;;  %s2807_s4 = inlined_call_operand.vmem [shape: f32[1,32], index: 4, kind: input, shape index: {}]   ;;  %s2808_s5 = inlined_call_operand.vmem [shape: f32[2,1], index: 5, kind: output, shape index: {}]  }
   0x1   :  { %1905 = vmatprep.subr.mxu1 %v2263_v0  ;;  %v2302_v1 = vld [vmem:[%s2803_s1 + $0x18] sm:$0xff]  ;;  %v2307_v2 = vld [vmem:[%s2803_s1 + $0x10] sm:$0xff]  ;;  %1913 = vmatprep.mubr.msk.f32.mxu1 %vm2264_vm0, %v2263_v0  ;;  %v2317_v3 = vld [vmem:[%s2803_s1 + $0x8] sm:$0xff]  ;;  %34 = vst.msk [vmem:[#allocation2] sm:$0x3] %vm33_vm1, %v2263_v0  ;;  %vm142_vm3 = vcmask 254976  }
   0x2   :  { %1906 = vmatpush3.msra.mxu1 %v2302_v1  ;;  %1935 = vmatprep.subr.mxu0 %v2263_v0  ;;  %v2326_v4 = vld [vmem:[%s2803_s1] sm:$0xff]  ;;  %v2354_v20 = vld [vmem:[%s2805_s2 + $0x38] sm:$0xff]  ;;  %v2359_v21 = vld [vmem:[%s2805_s2 + $0x30] sm:$0xff]  ;;  %137 = vst.msk [vmem:[#allocation2] sm:$0x3] %vm136_vm2, %v2263_v0  ;;  %vm36_vm4 = vcmask 261120  }
   0x3   :  { %1907 = vmatprep.subr.mxu1 %v2263_v0  ;;  %1936 = vmatpush3.msra.mxu0 %v2302_v1  ;;  %v35_v5 = vld [vmem:[%s2804_s0] sm:$0x3]  ;;  %v2369_v22 = vld [vmem:[%s2805_s2 + $0x28] sm:$0xff]  ;;  %v2386_v25 = vld [vmem:[%s2805_s2 + $0x18] sm:$0xff]  ;;  %vm145_vm5 = vcmask 523264   ;;  %s2267_s25 = smov 96  }
   0x4   :  { %1908 = vmatpush3.msra.mxu1 %v2307_v2  ;;  %1937 = vmatprep.subr.mxu0 %v2263_v0  ;;  %v2376_v23 = vld [vmem:[%s2805_s2 + $0x20] sm:$0xff]  ;;  %v2393_v26 = vld [vmem:[%s2805_s2 + $0x10] sm:$0xff]  ;;  %v2400_v27 = vld [vmem:[%s2805_s2 + $0x8] sm:$0xff]  ;;  %vm1731_vm6 = vcmask 1024  }
   0x5   :  { %1909 = vmatprep.subr.mxu1 %v2263_v0  ;;  %1938 = vmatpush3.msra.mxu0 %v2307_v2  ;;  %v2407_v28 = vld [vmem:[%s2805_s2] sm:$0xff] }
   0x6   :  { %1910 = vmatpush3.msra.mxu1 %v2317_v3  ;;  %1939 = vmatprep.subr.mxu0 %v2263_v0  ;;  %v1742_v33 = vld [vmem:[%s2804_s0 + $0x2] sm:$0x3]  ;;  %v2449_v38 = vld [vmem:[%s2806_s3] sm:$0x3] }
   0x7   :  { %1911 = vmatprep.subr.mxu1 %v2263_v0  ;;  %1940 = vmatpush3.msra.mxu0 %v2317_v3 }
   0x8   :  { %1912 = vmatpush3.msra.mxu1 %v2326_v4  ;;  %1941 = vmatprep.subr.mxu0 %v2263_v0 }
   0x9   :  { %1914 = vmatmul.mubr.f32.vlgmr.msra.gmra.mxu1 %v2263_v0  ;;  %1916 = vmatprep.subr.mxu1 %v2263_v0 }
   0xa   :  { %1942 = vmatpush3.msra.mxu0 %v2326_v4  ;;  %1943 = vmatprep.mubr.msk.f32.mxu0 %vm2264_vm0, %v2263_v0 }
   0xb   :  { %1932 = vmatprep.mubr.msk.f32.mxu1 %vm2264_vm0, %v2263_v0  ;;  %1946 = vmatprep.subr.mxu0 %v2263_v0 }
   0xc   :  { %1917 = vmatpush3.msra.mxu1 %v2354_v20 }
   0xd   :  { %1918 = vmatprep.subr.mxu1 %v2263_v0 }
   0xe   :  { %1919 = vmatpush3.msra.mxu1 %v2359_v21 }
   0xf   :  { %1920 = vmatprep.subr.mxu1 %v2263_v0 }
  0x10   :  { %1921 = vmatpush3.msra.mxu1 %v2369_v22 }
  0x11   :  { %1922 = vmatprep.subr.mxu1 %v2263_v0 }
  0x12   :  { %1923 = vmatpush3.msra.mxu1 %v2376_v23 }
  0x13   :  { %1924 = vmatprep.subr.mxu1 %v2263_v0 }
  0x14   :  { %1925 = vmatpush3.msra.mxu1 %v2386_v25 }
  0x15   :  { %1926 = vmatprep.subr.mxu1 %v2263_v0 }
  0x16   :  { %1927 = vmatpush3.msra.mxu1 %v2393_v26 }
  0x17   :  { %1928 = vmatprep.subr.mxu1 %v2263_v0 }
  0x18   :  { %1929 = vmatpush3.msra.mxu1 %v2400_v27 }
  0x19   :  { %1930 = vmatprep.subr.mxu1 %v2263_v0 }
  0x1a   :  { %1931 = vmatpush3.msra.mxu1 %v2407_v28 }
  0x1b   :  { %1965 = vmatprep.subr.mxu1 %v2263_v0 }
  0xc9   :  { %v106_v6 = vpop.f32.mrf.mxu1 }
  0xca   :  { %v110_v7 = vadd.f32 %v106_v6, %v35_v5 }
  0xcb   :  { %v1915_v8 = vpop.f32.mrf.mxu1 }
  0xcc   :  { %v1737_v9 = vmul.f32 -1.442695, %v110_v7 }
  0xce   :  { %2150 = vpow2.f32 %v1737_v9 }
  0xdb   :  { %v2151_v10 = vpop.eup %2150 }
  0xdc   :  { %v114_v11 = vadd.f32 1.0, %v2151_v10 }
  0xde   :  { %2152 = vrcp.f32 %v114_v11 }
  0xeb   :  { %v2153_v12 = vpop.eup %2152 }
  0xec   :  { %v117_v13 = vmul.f32 2.0, %v2153_v12  ;;  %v119_v17 = vmul.f32 0.0, %v2153_v12 }
  0xee   :  { %v1738_v14 = vadd.f32 -1.0, %v117_v13  ;;  %v1749_v13 = vld [vmem:[%s2804_s0 + $0x4] sm:$0x3] }
  0xf0   :  { %121 = vrot.lane.b32.xlu0 %v1738_v14, %s2265_s28 }
 0x162   :  { %v122_v15 = vpop.permute.xlu0 %121 }
 0x163   :  { %v124_v16 = vmul.f32 %v2153_v12, %v122_v15 }
 0x165   :  { %126 = vrot.lane.b32.xlu0 %v124_v16, %s2265_s28 }
 0x1d7   :  { %v127_v18 = vpop.permute.xlu0 %126 }
 0x1d8   :  { %v2348_v19 = vadd.f32 %v127_v18, %v119_v17 }
 0x1da   :  { %2154 = vtanh.f32 %v2348_v19 }
 0x1e7   :  { %v2155_v24 = vpop.eup %2154 }
 0x1e8   :  { %132 = vrot.lane.b32.xlu1 %v2155_v24, %s2265_s28 }
 0x25a   :  { %v133_v29 = vpop.permute.xlu1 %132 }
 0x25b   :  { %v135_v30 = vmul.f32 %v2153_v12, %v133_v29 }
 0x25d   :  { %139 = vrot.lane.b32.xlu1 %v135_v30, %s2266_s20 }
 0x2cf   :  { %v140_v31 = vpop.permute.xlu1 %139 }
 0x2d0   :  { %143 = vst.msk [vmem:[#allocation2] sm:$0x3] %vm142_vm3, %v140_v31  ;;  %1944 = vmatmul.mubr.msk.f32.vlgmr.msra.gmra.mxu0 %vm36_vm4, %v140_v31 }
 0x2d1   :  { %1947 = vmatpush3.msra.mxu0 %v2354_v20  ;;  %1962 = vmatprep.mubr.msk.f32.mxu0 %vm2264_vm0, %v2263_v0 }
 0x2d2   :  { %1948 = vmatprep.subr.mxu0 %v2263_v0 }
 0x2d3   :  { %1949 = vmatpush3.msra.mxu0 %v2359_v21 }
 0x2d4   :  { %1950 = vmatprep.subr.mxu0 %v2263_v0 }
 0x2d5   :  { %1951 = vmatpush3.msra.mxu0 %v2369_v22 }
 0x2d6   :  { %1952 = vmatprep.subr.mxu0 %v2263_v0 }
 0x2d7   :  { %v144_v32 = vld [vmem:[#allocation2] sm:$0x3]  ;;  %1953 = vmatpush3.msra.mxu0 %v2376_v23 }
 0x2d8   :  { %1933 = vmatmul.mubr.msk.f32.vlgmr.msra.gmra.mxu1 %vm145_vm5, %v144_v32  ;;  %1954 = vmatprep.subr.mxu0 %v2263_v0 }
 0x2d9   :  { %1966 = vmatpush3.msra.mxu1 %v2302_v1  ;;  %1973 = vmatprep.mubr.msk.f32.mxu1 %vm2264_vm0, %v2263_v0 }
 0x2da   :  { %1967 = vmatprep.subr.mxu1 %v2263_v0  ;;  %1955 = vmatpush3.msra.mxu0 %v2386_v25 }
 0x2db   :  { %1968 = vmatpush3.msra.mxu1 %v2307_v2  ;;  %1956 = vmatprep.subr.mxu0 %v2263_v0 }
 0x2dc   :  { %1969 = vmatprep.subr.mxu1 %v2263_v0  ;;  %1957 = vmatpush3.msra.mxu0 %v2393_v26 }
 0x2dd   :  { %1970 = vmatpush3.msra.mxu1 %v2317_v3  ;;  %1958 = vmatprep.subr.mxu0 %v2263_v0 }
 0x2de   :  { %1971 = vmatprep.subr.mxu1 %v2263_v0  ;;  %1959 = vmatpush3.msra.mxu0 %v2400_v27 }
 0x2df   :  { %1972 = vmatpush3.msra.mxu1 %v2326_v4  ;;  %1960 = vmatprep.subr.mxu0 %v2263_v0 }
 0x2e0   :  { %1961 = vmatpush3.msra.mxu0 %v2407_v28  ;;  %1976 = vmatprep.subr.mxu1 %v2263_v0 }
 0x2e1   :  { %1995 = vmatprep.subr.mxu0 %v2263_v0 }
 0x390   :  { %v314_v34 = vpop.f32.mrf.mxu0 }
 0x391   :  { %v318_v35 = vadd.f32 %v1742_v33, %v314_v34 }
 0x392   :  { %v1945_v36 = vpop.f32.mrf.mxu0 }
 0x393   :  { %v1744_v37 = vmul.f32 -1.442695, %v318_v35 }
 0x395   :  { %2156 = vpow2.f32 %v1744_v37 }
 0x398   :  { %v215_v39 = vpop.f32.mrf.mxu1 }
 0x399   :  { %v216_v40 = vadd.f32 %v215_v39, %v2449_v38 }
 0x39a   :  { %v1934_v41 = vpop.f32.mrf.mxu1 }
 0x39b   :  { %v1740_v42 = vmul.f32 -1.442695, %v216_v40 }
 0x39d   :  { %2158 = vpow2.f32 %v1740_v42 }
 0x3a2   :  { %v2157_v43 = vpop.eup %2156 }
 0x3a3   :  { %v322_v44 = vadd.f32 1.0, %v2157_v43 }
 0x3a5   :  { %2160 = vrcp.f32 %v322_v44 }
 0x3aa   :  { %v2159_v45 = vpop.eup %2158 }
 0x3ab   :  { %v222_v46 = vadd.f32 1.0, %v2159_v45 }
 0x3ad   :  { %2162 = vrcp.f32 %v222_v46 }
 0x3b2   :  { %v2161_v47 = vpop.eup %2160 }
 0x3b3   :  { %v325_v48 = vmul.f32 2.0, %v2161_v47  ;;  %v327_v57 = vmul.f32 %v2161_v47, %v2348_v19 }
 0x3b5   :  { %v1745_v49 = vadd.f32 -1.0, %v325_v48 }
 0x3b7   :  { %329 = vrot.lane.b32.xlu1 %v1745_v49, %s2265_s28 }
 0x3ba   :  { %v2163_v50 = vpop.eup %2162 }
 0x3bb   :  { %v225_v51 = vmul.f32 2.0, %v2163_v50  ;;  %v227_v60 = vmul.f32 0.0, %v2163_v50 }
 0x3bd   :  { %v1741_v52 = vadd.f32 -1.0, %v225_v51 }
 0x3bf   :  { %229 = vrot.lane.b32.xlu0 %v1741_v52, %s2265_s28 }
 0x429   :  { %v330_v53 = vpop.permute.xlu1 %329 }
 0x42a   :  { %v332_v54 = vmul.f32 %v2161_v47, %v330_v53 }
 0x42c   :  { %334 = vrot.lane.b32.xlu1 %v332_v54, %s2265_s28 }
 0x431   :  { %v230_v55 = vpop.permute.xlu0 %229 }
 0x432   :  { %v232_v56 = vmul.f32 %v2163_v50, %v230_v55 }
 0x434   :  { %234 = vrot.lane.b32.xlu0 %v232_v56, %s2265_s28 }
 0x49e   :  { %v335_v58 = vpop.permute.xlu1 %334 }
 0x49f   :  { %v2457_v59 = vadd.f32 %v335_v58, %v327_v57 }
 0x4a1   :  { %2164 = vtanh.f32 %v2457_v59 }
 0x4a6   :  { %v235_v61 = vpop.permute.xlu0 %234 }
 0x4a7   :  { %v2460_v62 = vadd.f32 %v235_v61, %v227_v60  ;;  %v1756_v60 = vld [vmem:[%s2804_s0 + $0x6] sm:$0x3] }
 0x4a9   :  { %2166 = vtanh.f32 %v2460_v62 }
 0x4ae   :  { %v2165_v63 = vpop.eup %2164 }
 0x4af   :  { %340 = vrot.lane.b32.xlu1 %v2165_v63, %s2265_s28 }
 0x4b6   :  { %v2167_v5 = vpop.eup %2166 }
 0x4b7   :  { %240 = vrot.lane.b32.xlu0 %v2167_v5, %s2265_s28 }
 0x521   :  { %v341_v6 = vpop.permute.xlu1 %340 }
 0x522   :  { %v343_v7 = vmul.f32 %v2161_v47, %v341_v6 }
 0x524   :  { %350 = vrot.lane.b32.xlu1 %v343_v7, %s2266_s20 }
 0x529   :  { %v241_v8 = vpop.permute.xlu0 %240 }
 0x52a   :  { %v243_v9 = vmul.f32 %v2163_v50, %v241_v8 }
 0x52c   :  { %345 = vrot.lane.b32.xlu0 %v243_v9, %s2267_s25 }
 0x596   :  { %v351_v10 = vpop.permute.xlu1 %350 }
 0x597   :  { %1974 = vmatmul.mubr.msk.f32.vlgmr.msra.gmra.mxu1 %vm36_vm4, %v351_v10 }
 0x598   :  { %1977 = vmatpush3.msra.mxu1 %v2354_v20  ;;  %1992 = vmatprep.mubr.msk.f32.mxu1 %vm2264_vm0, %v2263_v0 }
 0x599   :  { %1978 = vmatprep.subr.mxu1 %v2263_v0 }
 0x59a   :  { %1979 = vmatpush3.msra.mxu1 %v2359_v21 }
 0x59b   :  { %1980 = vmatprep.subr.mxu1 %v2263_v0 }
 0x59c   :  { %1981 = vmatpush3.msra.mxu1 %v2369_v22 }
 0x59d   :  { %1982 = vmatprep.subr.mxu1 %v2263_v0 }
 0x59e   :  { %v346_v11 = vpop.permute.xlu0 %345  ;;  %1983 = vmatpush3.msra.mxu1 %v2376_v23 }
 0x59f   :  { %348 = vst.msk [vmem:[#allocation2] sm:$0x3] %vm136_vm2, %v346_v11  ;;  %1984 = vmatprep.subr.mxu1 %v2263_v0 }
 0x5a0   :  { %353 = vst.msk [vmem:[#allocation2] sm:$0x3] %vm142_vm3, %v351_v10  ;;  %1985 = vmatpush3.msra.mxu1 %v2386_v25 }
 0x5a1   :  { %1986 = vmatprep.subr.mxu1 %v2263_v0 }
 0x5a2   :  { %1987 = vmatpush3.msra.mxu1 %v2393_v26 }
 0x5a3   :  { %1988 = vmatprep.subr.mxu1 %v2263_v0 }
 0x5a4   :  { %1989 = vmatpush3.msra.mxu1 %v2400_v27 }
 0x5a5   :  { %1990 = vmatprep.subr.mxu1 %v2263_v0 }
 0x5a6   :  { %1991 = vmatpush3.msra.mxu1 %v2407_v28 }
 0x5a7   :  { %v354_v12 = vld [vmem:[#allocation2] sm:$0x3]  ;;  %2025 = vmatprep.subr.mxu1 %v2263_v0 }
 0x5a8   :  { %1963 = vmatmul.mubr.msk.f32.vlgmr.msra.gmra.mxu0 %vm145_vm5, %v354_v12 }
 0x5a9   :  { %1996 = vmatpush3.msra.mxu0 %v2302_v1  ;;  %2003 = vmatprep.mubr.msk.f32.mxu0 %vm2264_vm0, %v2263_v0 }
 0x5aa   :  { %1997 = vmatprep.subr.mxu0 %v2263_v0 }
 0x5ab   :  { %1998 = vmatpush3.msra.mxu0 %v2307_v2 }
 0x5ac   :  { %1999 = vmatprep.subr.mxu0 %v2263_v0 }
 0x5ad   :  { %2000 = vmatpush3.msra.mxu0 %v2317_v3 }
 0x5ae   :  { %2001 = vmatprep.subr.mxu0 %v2263_v0 }
 0x5af   :  { %2002 = vmatpush3.msra.mxu0 %v2326_v4 }
 0x5b0   :  { %2006 = vmatprep.subr.mxu0 %v2263_v0 }
 0x657   :  { %v523_v14 = vpop.f32.mrf.mxu1 }
 0x658   :  { %v527_v15 = vadd.f32 %v1749_v13, %v523_v14 }
 0x659   :  { %v1975_v16 = vpop.f32.mrf.mxu1 }
 0x65a   :  { %v1751_v17 = vmul.f32 -1.442695, %v527_v15 }
 0x65c   :  { %2168 = vpow2.f32 %v1751_v17 }
 0x668   :  { %v424_v18 = vpop.f32.mrf.mxu0 }
 0x669   :  { %v2169_v19 = vpop.eup %2168  ;;  %v425_v24 = vadd.f32 %v424_v18, %v2449_v38 }
 0x66a   :  { %v531_v29 = vadd.f32 1.0, %v2169_v19  ;;  %v1964_v30 = vpop.f32.mrf.mxu0 }
 0x66b   :  { %v1747_v31 = vmul.f32 -1.442695, %v425_v24 }
 0x66c   :  { %2170 = vrcp.f32 %v531_v29 }
 0x66d   :  { %2172 = vpow2.f32 %v1747_v31 }
 0x679   :  { %v2171_v32 = vpop.eup %2170 }
 0x67a   :  { %v2173_v33 = vpop.eup %2172  ;;  %v534_v34 = vmul.f32 2.0, %v2171_v32  ;;  %v536_v45 = vmul.f32 %v2171_v32, %v2457_v59 }
 0x67b   :  { %v431_v35 = vadd.f32 1.0, %v2173_v33 }
 0x67c   :  { %v1752_v36 = vadd.f32 -1.0, %v534_v34 }
 0x67d   :  { %2174 = vrcp.f32 %v431_v35 }
 0x67e   :  { %538 = vrot.lane.b32.xlu1 %v1752_v36, %s2265_s28 }
 0x68a   :  { %v2175_v37 = vpop.eup %2174 }
 0x68b   :  { %v434_v39 = vmul.f32 2.0, %v2175_v37  ;;  %v436_v49 = vmul.f32 %v2175_v37, %v2460_v62 }
 0x68d   :  { %v1748_v40 = vadd.f32 -1.0, %v434_v39 }
 0x68f   :  { %438 = vrot.lane.b32.xlu0 %v1748_v40, %s2265_s28 }
 0x6f0   :  { %v539_v41 = vpop.permute.xlu1 %538 }
 0x6f1   :  { %v541_v42 = vmul.f32 %v2171_v32, %v539_v41 }
 0x6f3   :  { %543 = vrot.lane.b32.xlu1 %v541_v42, %s2265_s28 }
 0x701   :  { %v439_v43 = vpop.permute.xlu0 %438 }
 0x702   :  { %v441_v44 = vmul.f32 %v2175_v37, %v439_v43 }
 0x704   :  { %443 = vrot.lane.b32.xlu0 %v441_v44, %s2265_s28 }
 0x765   :  { %v544_v46 = vpop.permute.xlu1 %543 }
 0x766   :  { %v2508_v47 = vadd.f32 %v544_v46, %v536_v45 }
 0x768   :  { %2176 = vtanh.f32 %v2508_v47 }
 0x775   :  { %v2177_v48 = vpop.eup %2176 }
 0x776   :  { %v444_v50 = vpop.permute.xlu0 %443  ;;  %549 = vrot.lane.b32.xlu1 %v2177_v48, %s2265_s28  ;;  %v1763_v48 = vld [vmem:[%s2804_s0 + $0x8] sm:$0x3] }
 0x777   :  { %v2513_v51 = vadd.f32 %v444_v50, %v436_v49 }
 0x779   :  { %2178 = vtanh.f32 %v2513_v51 }
 0x786   :  { %v2179_v52 = vpop.eup %2178 }
 0x787   :  { %449 = vrot.lane.b32.xlu0 %v2179_v52, %s2265_s28 }
 0x7e8   :  { %v550_v53 = vpop.permute.xlu1 %549 }
 0x7e9   :  { %v552_v54 = vmul.f32 %v2171_v32, %v550_v53 }
 0x7eb   :  { %559 = vrot.lane.b32.xlu1 %v552_v54, %s2266_s20 }
 0x7f9   :  { %v450_v55 = vpop.permute.xlu0 %449 }
 0x7fa   :  { %v452_v56 = vmul.f32 %v2175_v37, %v450_v55 }
 0x7fc   :  { %554 = vrot.lane.b32.xlu0 %v452_v56, %s2267_s25 }
 0x85d   :  { %v560_v57 = vpop.permute.xlu1 %559 }
 0x85e   :  { %2004 = vmatmul.mubr.msk.f32.vlgmr.msra.gmra.mxu0 %vm36_vm4, %v560_v57 }
 0x85f   :  { %2007 = vmatpush3.msra.mxu0 %v2354_v20  ;;  %2022 = vmatprep.mubr.msk.f32.mxu0 %vm2264_vm0, %v2263_v0 }
 0x860   :  { %2008 = vmatprep.subr.mxu0 %v2263_v0 }
 0x861   :  { %2009 = vmatpush3.msra.mxu0 %v2359_v21 }
 0x862   :  { %2010 = vmatprep.subr.mxu0 %v2263_v0 }
 0x863   :  { %2011 = vmatpush3.msra.mxu0 %v2369_v22 }
 0x864   :  { %2012 = vmatprep.subr.mxu0 %v2263_v0 }
 0x865   :  { %2013 = vmatpush3.msra.mxu0 %v2376_v23 }
 0x866   :  { %2014 = vmatprep.subr.mxu0 %v2263_v0 }
 0x867   :  { %2015 = vmatpush3.msra.mxu0 %v2386_v25 }
 0x868   :  { %2016 = vmatprep.subr.mxu0 %v2263_v0 }
 0x869   :  { %2017 = vmatpush3.msra.mxu0 %v2393_v26 }
 0x86a   :  { %2018 = vmatprep.subr.mxu0 %v2263_v0 }
 0x86b   :  { %2019 = vmatpush3.msra.mxu0 %v2400_v27 }
 0x86c   :  { %2020 = vmatprep.subr.mxu0 %v2263_v0 }
 0x86d   :  { %2021 = vmatpush3.msra.mxu0 %v2407_v28 }
 0x86e   :  { %v555_v58 = vpop.permute.xlu0 %554  ;;  %2055 = vmatprep.subr.mxu0 %v2263_v0 }
 0x86f   :  { %557 = vst.msk [vmem:[#allocation2] sm:$0x3] %vm136_vm2, %v555_v58 }
 0x870   :  { %562 = vst.msk [vmem:[#allocation2] sm:$0x3] %vm142_vm3, %v560_v57 }
 0x877   :  { %v563_v59 = vld [vmem:[#allocation2] sm:$0x3] }
 0x878   :  { %1993 = vmatmul.mubr.msk.f32.vlgmr.msra.gmra.mxu1 %vm145_vm5, %v563_v59 }
 0x879   :  { %2026 = vmatpush3.msra.mxu1 %v2302_v1  ;;  %2033 = vmatprep.mubr.msk.f32.mxu1 %vm2264_vm0, %v2263_v0 }
 0x87a   :  { %2027 = vmatprep.subr.mxu1 %v2263_v0 }
 0x87b   :  { %2028 = vmatpush3.msra.mxu1 %v2307_v2 }
 0x87c   :  { %2029 = vmatprep.subr.mxu1 %v2263_v0 }
 0x87d   :  { %2030 = vmatpush3.msra.mxu1 %v2317_v3 }
 0x87e   :  { %2031 = vmatprep.subr.mxu1 %v2263_v0 }
 0x87f   :  { %2032 = vmatpush3.msra.mxu1 %v2326_v4 }
 0x880   :  { %2036 = vmatprep.subr.mxu1 %v2263_v0 }
 0x91e   :  { %v732_v61 = vpop.f32.mrf.mxu0 }
 0x91f   :  { %v736_v62 = vadd.f32 %v1756_v60, %v732_v61 }
 0x920   :  { %v2005_v63 = vpop.f32.mrf.mxu0 }
 0x921   :  { %v1758_v5 = vmul.f32 -1.442695, %v736_v62 }
 0x923   :  { %2180 = vpow2.f32 %v1758_v5 }
 0x930   :  { %v2181_v6 = vpop.eup %2180 }
 0x931   :  { %v740_v7 = vadd.f32 1.0, %v2181_v6 }
 0x933   :  { %2182 = vrcp.f32 %v740_v7 }
 0x938   :  { %v633_v8 = vpop.f32.mrf.mxu1 }
 0x939   :  { %v634_v9 = vadd.f32 %v633_v8, %v2449_v38 }
 0x93a   :  { %v1994_v10 = vpop.f32.mrf.mxu1 }
 0x93b   :  { %v1754_v11 = vmul.f32 -1.442695, %v634_v9 }
 0x93d   :  { %2184 = vpow2.f32 %v1754_v11 }
 0x940   :  { %v2183_v12 = vpop.eup %2182 }
 0x941   :  { %v743_v13 = vmul.f32 2.0, %v2183_v12  ;;  %v745_v32 = vmul.f32 %v2183_v12, %v2508_v47 }
 0x943   :  { %v1759_v14 = vadd.f32 -1.0, %v743_v13 }
 0x945   :  { %747 = vrot.lane.b32.xlu1 %v1759_v14, %s2265_s28 }
 0x94a   :  { %v2185_v15 = vpop.eup %2184 }
 0x94b   :  { %v640_v16 = vadd.f32 1.0, %v2185_v15 }
 0x94d   :  { %2186 = vrcp.f32 %v640_v16 }
 0x95a   :  { %v2187_v17 = vpop.eup %2186 }
 0x95b   :  { %v643_v18 = vmul.f32 2.0, %v2187_v17  ;;  %v645_v36 = vmul.f32 %v2187_v17, %v2513_v51 }
 0x95d   :  { %v1755_v19 = vadd.f32 -1.0, %v643_v18 }
 0x95f   :  { %647 = vrot.lane.b32.xlu0 %v1755_v19, %s2265_s28 }
 0x9b7   :  { %v748_v24 = vpop.permute.xlu1 %747 }
 0x9b8   :  { %v750_v29 = vmul.f32 %v2183_v12, %v748_v24 }
 0x9ba   :  { %752 = vrot.lane.b32.xlu1 %v750_v29, %s2265_s28 }
 0x9d1   :  { %v648_v30 = vpop.permute.xlu0 %647 }
 0x9d2   :  { %v650_v31 = vmul.f32 %v2187_v17, %v648_v30 }
 0x9d4   :  { %652 = vrot.lane.b32.xlu0 %v650_v31, %s2265_s28 }
 0xa2c   :  { %v753_v33 = vpop.permute.xlu1 %752 }
 0xa2d   :  { %v2560_v34 = vadd.f32 %v753_v33, %v745_v32 }
 0xa2f   :  { %2188 = vtanh.f32 %v2560_v34 }
 0xa3c   :  { %v2189_v35 = vpop.eup %2188 }
 0xa3d   :  { %758 = vrot.lane.b32.xlu1 %v2189_v35, %s2265_s28 }
 0xa46   :  { %v653_v37 = vpop.permute.xlu0 %652 }
 0xa47   :  { %v2565_v39 = vadd.f32 %v653_v37, %v645_v36 }
 0xa49   :  { %2190 = vtanh.f32 %v2565_v39 }
 0xa56   :  { %v2191_v40 = vpop.eup %2190 }
 0xa57   :  { %658 = vrot.lane.b32.xlu0 %v2191_v40, %s2265_s28 }
 0xaaf   :  { %v759_v41 = vpop.permute.xlu1 %758 }
 0xab0   :  { %v761_v42 = vmul.f32 %v2183_v12, %v759_v41 }
 0xab2   :  { %768 = vrot.lane.b32.xlu1 %v761_v42, %s2266_s20 }
 0xac9   :  { %v659_v43 = vpop.permute.xlu0 %658 }
 0xaca   :  { %v661_v44 = vmul.f32 %v2187_v17, %v659_v43 }
 0xacc   :  { %763 = vrot.lane.b32.xlu0 %v661_v44, %s2267_s25 }
 0xb24   :  { %v769_v45 = vpop.permute.xlu1 %768 }
 0xb25   :  { %2034 = vmatmul.mubr.msk.f32.vlgmr.msra.gmra.mxu1 %vm36_vm4, %v769_v45 }
 0xb26   :  { %2037 = vmatpush3.msra.mxu1 %v2354_v20  ;;  %2052 = vmatprep.mubr.msk.f32.mxu1 %vm2264_vm0, %v2263_v0 }
 0xb27   :  { %2038 = vmatprep.subr.mxu1 %v2263_v0 }
 0xb28   :  { %2039 = vmatpush3.msra.mxu1 %v2359_v21 }
 0xb29   :  { %2040 = vmatprep.subr.mxu1 %v2263_v0 }
 0xb2a   :  { %2041 = vmatpush3.msra.mxu1 %v2369_v22 }
 0xb2b   :  { %2042 = vmatprep.subr.mxu1 %v2263_v0 }
 0xb2c   :  { %2043 = vmatpush3.msra.mxu1 %v2376_v23 }
 0xb2d   :  { %2044 = vmatprep.subr.mxu1 %v2263_v0 }
 0xb2e   :  { %2045 = vmatpush3.msra.mxu1 %v2386_v25 }
 0xb2f   :  { %2046 = vmatprep.subr.mxu1 %v2263_v0 }
 0xb30   :  { %2047 = vmatpush3.msra.mxu1 %v2393_v26 }
 0xb31   :  { %2048 = vmatprep.subr.mxu1 %v2263_v0 }
 0xb32   :  { %2049 = vmatpush3.msra.mxu1 %v2400_v27 }
 0xb33   :  { %2050 = vmatprep.subr.mxu1 %v2263_v0 }
 0xb34   :  { %2051 = vmatpush3.msra.mxu1 %v2407_v28 }
 0xb35   :  { %2085 = vmatprep.subr.mxu1 %v2263_v0 }
 0xb3e   :  { %v764_v46 = vpop.permute.xlu0 %763 }
 0xb3f   :  { %766 = vst.msk [vmem:[#allocation2] sm:$0x3] %vm136_vm2, %v764_v46 }
 0xb40   :  { %771 = vst.msk [vmem:[#allocation2] sm:$0x3] %vm142_vm3, %v769_v45 }
 0xb47   :  { %v772_v47 = vld [vmem:[#allocation2] sm:$0x3] }
 0xb48   :  { %2023 = vmatmul.mubr.msk.f32.vlgmr.msra.gmra.mxu0 %vm145_vm5, %v772_v47 }
 0xb49   :  { %2056 = vmatpush3.msra.mxu0 %v2302_v1  ;;  %2063 = vmatprep.mubr.msk.f32.mxu0 %vm2264_vm0, %v2263_v0 }
 0xb4a   :  { %2057 = vmatprep.subr.mxu0 %v2263_v0 }
 0xb4b   :  { %2058 = vmatpush3.msra.mxu0 %v2307_v2 }
 0xb4c   :  { %2059 = vmatprep.subr.mxu0 %v2263_v0 }
 0xb4d   :  { %2060 = vmatpush3.msra.mxu0 %v2317_v3 }
 0xb4e   :  { %2061 = vmatprep.subr.mxu0 %v2263_v0 }
 0xb4f   :  { %2062 = vmatpush3.msra.mxu0 %v2326_v4 }
 0xb50   :  { %2066 = vmatprep.subr.mxu0 %v2263_v0 }
 0xbe5   :  { %v941_v49 = vpop.f32.mrf.mxu1 }
 0xbe6   :  { %v945_v50 = vadd.f32 %v1763_v48, %v941_v49 }
 0xbe7   :  { %v2035_v51 = vpop.f32.mrf.mxu1 }
 0xbe8   :  { %v1765_v52 = vmul.f32 -1.442695, %v945_v50 }
 0xbea   :  { %2192 = vpow2.f32 %v1765_v52 }
 0xbf7   :  { %v2193_v53 = vpop.eup %2192 }
 0xbf8   :  { %v949_v54 = vadd.f32 1.0, %v2193_v53 }
 0xbfa   :  { %2194 = vrcp.f32 %v949_v54 }
 0xc07   :  { %v2195_v55 = vpop.eup %2194 }
 0xc08   :  { %v842_v56 = vpop.f32.mrf.mxu0  ;;  %v952_v57 = vmul.f32 2.0, %v2195_v55  ;;  %v954_v12 = vmul.f32 %v2195_v55, %v2560_v34 }
 0xc09   :  { %v843_v58 = vadd.f32 %v842_v56, %v2449_v38 }
 0xc0a   :  { %v2024_v59 = vpop.f32.mrf.mxu0  ;;  %v1766_v60 = vadd.f32 -1.0, %v952_v57 }
 0xc0b   :  { %v1761_v61 = vmul.f32 -1.442695, %v843_v58 }
 0xc0c   :  { %956 = vrot.lane.b32.xlu1 %v1766_v60, %s2265_s28 }
 0xc0d   :  { %2196 = vpow2.f32 %v1761_v61 }
 0xc1a   :  { %v2197_v62 = vpop.eup %2196 }
 0xc1b   :  { %v849_v63 = vadd.f32 1.0, %v2197_v62 }
 0xc1d   :  { %2198 = vrcp.f32 %v849_v63 }
 0xc2a   :  { %v2199_v5 = vpop.eup %2198 }
 0xc2b   :  { %v852_v6 = vmul.f32 2.0, %v2199_v5  ;;  %v854_v16 = vmul.f32 %v2199_v5, %v2565_v39 }
 0xc2d   :  { %v1762_v7 = vadd.f32 -1.0, %v852_v6 }
 0xc2f   :  { %856 = vrot.lane.b32.xlu0 %v1762_v7, %s2265_s28 }
 0xc7e   :  { %v957_v8 = vpop.permute.xlu1 %956 }
 0xc7f   :  { %v959_v9 = vmul.f32 %v2195_v55, %v957_v8 }
 0xc81   :  { %961 = vrot.lane.b32.xlu1 %v959_v9, %s2265_s28 }
 0xca1   :  { %v857_v10 = vpop.permute.xlu0 %856 }
 0xca2   :  { %v859_v11 = vmul.f32 %v2199_v5, %v857_v10 }
 0xca4   :  { %861 = vrot.lane.b32.xlu0 %v859_v11, %s2265_s28 }
 0xcf3   :  { %v962_v13 = vpop.permute.xlu1 %961 }
 0xcf4   :  { %v2612_v14 = vadd.f32 %v962_v13, %v954_v12 }
 0xcf6   :  { %2200 = vtanh.f32 %v2612_v14 }
 0xd03   :  { %v2201_v15 = vpop.eup %2200 }
 0xd04   :  { %967 = vrot.lane.b32.xlu1 %v2201_v15, %s2265_s28 }
 0xd16   :  { %v862_v17 = vpop.permute.xlu0 %861 }
 0xd17   :  { %v2617_v18 = vadd.f32 %v862_v17, %v854_v16 }
 0xd19   :  { %2202 = vtanh.f32 %v2617_v18 }
 0xd26   :  { %v2203_v19 = vpop.eup %2202 }
 0xd27   :  { %867 = vrot.lane.b32.xlu0 %v2203_v19, %s2265_s28 }
 0xd76   :  { %v968_v24 = vpop.permute.xlu1 %967 }
 0xd77   :  { %v970_v29 = vmul.f32 %v2195_v55, %v968_v24 }
 0xd79   :  { %977 = vrot.lane.b32.xlu1 %v970_v29, %s2266_s20 }
 0xd99   :  { %v868_v30 = vpop.permute.xlu0 %867 }
 0xd9a   :  { %v870_v31 = vmul.f32 %v2199_v5, %v868_v30 }
 0xd9c   :  { %972 = vrot.lane.b32.xlu0 %v870_v31, %s2267_s25 }
 0xdeb   :  { %v978_v32 = vpop.permute.xlu1 %977 }
 0xdec   :  { %2064 = vmatmul.mubr.msk.f32.vlgmr.msra.gmra.mxu0 %vm36_vm4, %v978_v32 }
 0xded   :  { %2067 = vmatpush3.msra.mxu0 %v2354_v20  ;;  %2082 = vmatprep.mubr.msk.f32.mxu0 %vm2264_vm0, %v2263_v0 }
 0xdee   :  { %2068 = vmatprep.subr.mxu0 %v2263_v0 }
 0xdef   :  { %2069 = vmatpush3.msra.mxu0 %v2359_v21 }
 0xdf0   :  { %2070 = vmatprep.subr.mxu0 %v2263_v0 }
 0xdf1   :  { %2071 = vmatpush3.msra.mxu0 %v2369_v22 }
 0xdf2   :  { %2072 = vmatprep.subr.mxu0 %v2263_v0 }
 0xdf3   :  { %2073 = vmatpush3.msra.mxu0 %v2376_v23 }
 0xdf4   :  { %2074 = vmatprep.subr.mxu0 %v2263_v0 }
 0xdf5   :  { %2075 = vmatpush3.msra.mxu0 %v2386_v25 }
 0xdf6   :  { %2076 = vmatprep.subr.mxu0 %v2263_v0 }
 0xdf7   :  { %2077 = vmatpush3.msra.mxu0 %v2393_v26 }
 0xdf8   :  { %2078 = vmatprep.subr.mxu0 %v2263_v0 }
 0xdf9   :  { %2079 = vmatpush3.msra.mxu0 %v2400_v27 }
 0xdfa   :  { %2080 = vmatprep.subr.mxu0 %v2263_v0 }
 0xdfb   :  { %2081 = vmatpush3.msra.mxu0 %v2407_v28 }
 0xdfc   :  { %2115 = vmatprep.subr.mxu0 %v2263_v0 }
 0xe0e   :  { %v973_v33 = vpop.permute.xlu0 %972 }
 0xe0f   :  { %975 = vst.msk [vmem:[#allocation2] sm:$0x3] %vm136_vm2, %v973_v33 }
 0xe10   :  { %980 = vst.msk [vmem:[#allocation2] sm:$0x3] %vm142_vm3, %v978_v32 }
 0xe17   :  { %v981_v34 = vld [vmem:[#allocation2] sm:$0x3] }
 0xe18   :  { %2053 = vmatmul.mubr.msk.f32.vlgmr.msra.gmra.mxu1 %vm145_vm5, %v981_v34 }
 0xe19   :  { %2086 = vmatpush3.msra.mxu1 %v2302_v1  ;;  %2093 = vmatprep.mubr.msk.f32.mxu1 %vm2264_vm0, %v2263_v0  ;;  %v1770_v1 = vld [vmem:[%s2804_s0 + $0xa] sm:$0x3] }
 0xe1a   :  { %2087 = vmatprep.subr.mxu1 %v2263_v0 }
 0xe1b   :  { %2088 = vmatpush3.msra.mxu1 %v2307_v2 }
 0xe1c   :  { %2089 = vmatprep.subr.mxu1 %v2263_v0 }
 0xe1d   :  { %2090 = vmatpush3.msra.mxu1 %v2317_v3 }
 0xe1e   :  { %2091 = vmatprep.subr.mxu1 %v2263_v0 }
 0xe1f   :  { %2092 = vmatpush3.msra.mxu1 %v2326_v4 }
 0xe20   :  { %2096 = vmatprep.subr.mxu1 %v2263_v0 }
 0xeac   :  { %v1150_v35 = vpop.f32.mrf.mxu0 }
 0xead   :  { %v1154_v36 = vadd.f32 %v1770_v1, %v1150_v35 }
 0xeae   :  { %v2065_v37 = vpop.f32.mrf.mxu0 }
 0xeaf   :  { %v1772_v39 = vmul.f32 -1.442695, %v1154_v36 }
 0xeb1   :  { %2204 = vpow2.f32 %v1772_v39 }
 0xebe   :  { %v2205_v2 = vpop.eup %2204 }
 0xebf   :  { %v1158_v40 = vadd.f32 1.0, %v2205_v2 }
 0xec1   :  { %2206 = vrcp.f32 %v1158_v40 }
 0xece   :  { %v2207_v41 = vpop.eup %2206 }
 0xecf   :  { %v1161_v3 = vmul.f32 2.0, %v2207_v41  ;;  %v1163_v55 = vmul.f32 %v2207_v41, %v2612_v14 }
 0xed1   :  { %v1773_v42 = vadd.f32 -1.0, %v1161_v3 }
 0xed3   :  { %1165 = vrot.lane.b32.xlu1 %v1773_v42, %s2265_s28 }
 0xed8   :  { %v1051_v4 = vpop.f32.mrf.mxu1 }
 0xed9   :  { %v1052_v43 = vadd.f32 %v1051_v4, %v2449_v38 }
 0xeda   :  { %v2054_v44 = vpop.f32.mrf.mxu1 }
 0xedb   :  { %v1768_v45 = vmul.f32 -1.442695, %v1052_v43 }
 0xedd   :  { %2208 = vpow2.f32 %v1768_v45 }
 0xeea   :  { %v2209_v46 = vpop.eup %2208 }
 0xeeb   :  { %v1058_v47 = vadd.f32 1.0, %v2209_v46 }
 0xeed   :  { %2210 = vrcp.f32 %v1058_v47 }
 0xefa   :  { %v2211_v48 = vpop.eup %2210 }
 0xefb   :  { %v1061_v49 = vmul.f32 2.0, %v2211_v48  ;;  %v1063_v59 = vmul.f32 %v2211_v48, %v2617_v18 }
 0xefd   :  { %v1769_v50 = vadd.f32 -1.0, %v1061_v49  ;;  %v2255_v49 = vld [vmem:[%s2805_s2 + $0x30] sm:$0xff] }
 0xeff   :  { %1065 = vrot.lane.b32.xlu0 %v1769_v50, %s2265_s28  ;;  %v2256_v50 = vld [vmem:[%s2805_s2 + $0x28] sm:$0xff] }
 0xf45   :  { %v1166_v51 = vpop.permute.xlu1 %1165 }
 0xf46   :  { %v1168_v52 = vmul.f32 %v2207_v41, %v1166_v51  ;;  %v2257_v51 = vld [vmem:[%s2805_s2 + $0x20] sm:$0xff] }
 0xf48   :  { %1170 = vrot.lane.b32.xlu1 %v1168_v52, %s2265_s28  ;;  %v2258_v52 = vld [vmem:[%s2805_s2 + $0x18] sm:$0xff] }
 0xf71   :  { %v1066_v53 = vpop.permute.xlu0 %1065 }
 0xf72   :  { %v1068_v54 = vmul.f32 %v2211_v48, %v1066_v53  ;;  %v2259_v53 = vld [vmem:[%s2805_s2 + $0x10] sm:$0xff] }
 0xf74   :  { %1070 = vrot.lane.b32.xlu0 %v1068_v54, %s2265_s28  ;;  %v2260_v54 = vld [vmem:[%s2805_s2 + $0x8] sm:$0xff] }
 0xfba   :  { %v1171_v56 = vpop.permute.xlu1 %1170 }
 0xfbb   :  { %v2664_v57 = vadd.f32 %v1171_v56, %v1163_v55  ;;  %v2261_v55 = vld [vmem:[%s2805_s2] sm:$0xff] }
 0xfbd   :  { %2212 = vtanh.f32 %v2664_v57 }
 0xfca   :  { %v2213_v58 = vpop.eup %2212 }
 0xfcb   :  { %1176 = vrot.lane.b32.xlu1 %v2213_v58, %s2265_s28  ;;  %v1784_v58 = vld [vmem:[%s2804_s0 + $0xe] sm:$0x3] }
 0xfe6   :  { %v1071_v60 = vpop.permute.xlu0 %1070 }
 0xfe7   :  { %v2669_v61 = vadd.f32 %v1071_v60, %v1063_v59 }
 0xfe9   :  { %2214 = vtanh.f32 %v2669_v61 }
 0xff6   :  { %v2215_v62 = vpop.eup %2214 }
 0xff7   :  { %1076 = vrot.lane.b32.xlu0 %v2215_v62, %s2265_s28 }
0x103d   :  { %v1177_v63 = vpop.permute.xlu1 %1176 }
0x103e   :  { %v1179_v5 = vmul.f32 %v2207_v41, %v1177_v63 }
0x1040   :  { %1186 = vrot.lane.b32.xlu1 %v1179_v5, %s2266_s20 }
0x1069   :  { %v1077_v6 = vpop.permute.xlu0 %1076 }
0x106a   :  { %v1079_v7 = vmul.f32 %v2211_v48, %v1077_v6  ;;  %v2254_v48 = vld [vmem:[%s2805_s2 + $0x38] sm:$0xff] }
0x106c   :  { %1181 = vrot.lane.b32.xlu0 %v1079_v7, %s2267_s25 }
0x10b2   :  { %v1187_v8 = vpop.permute.xlu1 %1186 }
0x10b3   :  { %2094 = vmatmul.mubr.msk.f32.vlgmr.msra.gmra.mxu1 %vm36_vm4, %v1187_v8 }
0x10b4   :  { %2097 = vmatpush3.msra.mxu1 %v2354_v20  ;;  %2112 = vmatprep.mubr.msk.f32.mxu1 %vm2264_vm0, %v2263_v0 }
0x10b5   :  { %2098 = vmatprep.subr.mxu1 %v2263_v0 }
0x10b6   :  { %2099 = vmatpush3.msra.mxu1 %v2359_v21 }
0x10b7   :  { %2100 = vmatprep.subr.mxu1 %v2263_v0 }
0x10b8   :  { %2101 = vmatpush3.msra.mxu1 %v2369_v22  ;;  %v2250_v22 = vld [vmem:[%s2803_s1 + $0x18] sm:$0xff] }
0x10b9   :  { %2102 = vmatprep.subr.mxu1 %v2263_v0 }
0x10ba   :  { %2103 = vmatpush3.msra.mxu1 %v2376_v23  ;;  %v2251_v23 = vld [vmem:[%s2803_s1 + $0x10] sm:$0xff] }
0x10bb   :  { %2104 = vmatprep.subr.mxu1 %v2263_v0 }
0x10bc   :  { %2105 = vmatpush3.msra.mxu1 %v2386_v25  ;;  %v2252_v25 = vld [vmem:[%s2803_s1 + $0x8] sm:$0xff] }
0x10bd   :  { %2106 = vmatprep.subr.mxu1 %v2263_v0 }
0x10be   :  { %2107 = vmatpush3.msra.mxu1 %v2393_v26  ;;  %v2253_v26 = vld [vmem:[%s2803_s1] sm:$0xff] }
0x10bf   :  { %2108 = vmatprep.subr.mxu1 %v2263_v0 }
0x10c0   :  { %2109 = vmatpush3.msra.mxu1 %v2400_v27  ;;  %v1777_v27 = vld [vmem:[%s2804_s0 + $0xc] sm:$0x3] }
0x10c1   :  { %2110 = vmatprep.subr.mxu1 %v2263_v0 }
0x10c2   :  { %2111 = vmatpush3.msra.mxu1 %v2407_v28 }
0x10de   :  { %v1182_v20 = vpop.permute.xlu0 %1181 }
0x10df   :  { %1184 = vst.msk [vmem:[#allocation2] sm:$0x3] %vm136_vm2, %v1182_v20 }
0x10e0   :  { %1189 = vst.msk [vmem:[#allocation2] sm:$0x3] %vm142_vm3, %v1187_v8 }
0x10e7   :  { %v1190_v21 = vld [vmem:[#allocation2] sm:$0x3] }
0x10e8   :  { %2083 = vmatmul.mubr.msk.f32.vlgmr.msra.gmra.mxu0 %vm145_vm5, %v1190_v21 }
0x10e9   :  { %2116 = vmatpush3.msra.mxu0 %v2250_v22  ;;  %2123 = vmatprep.mubr.msk.f32.mxu0 %vm2264_vm0, %v2263_v0 }
0x10ea   :  { %2117 = vmatprep.subr.mxu0 %v2263_v0 }
0x10eb   :  { %2118 = vmatpush3.msra.mxu0 %v2251_v23 }
0x10ec   :  { %2119 = vmatprep.subr.mxu0 %v2263_v0 }
0x10ed   :  { %2120 = vmatpush3.msra.mxu0 %v2252_v25 }
0x10ee   :  { %2121 = vmatprep.subr.mxu0 %v2263_v0 }
0x10ef   :  { %2122 = vmatpush3.msra.mxu0 %v2253_v26 }
0x10f0   :  { %2126 = vmatprep.subr.mxu0 %v2263_v0 }
0x1173   :  { %v1359_v28 = vpop.f32.mrf.mxu1 }
0x1174   :  { %v1363_v9 = vadd.f32 %v1777_v27, %v1359_v28 }
0x1175   :  { %v2095_v10 = vpop.f32.mrf.mxu1 }
0x1176   :  { %v1779_v11 = vmul.f32 -1.442695, %v1363_v9 }
0x1178   :  { %2216 = vpow2.f32 %v1779_v11 }
0x1185   :  { %v2217_v12 = vpop.eup %2216 }
0x1186   :  { %v1367_v13 = vadd.f32 1.0, %v2217_v12 }
0x1188   :  { %2218 = vrcp.f32 %v1367_v13 }
0x1195   :  { %v2219_v14 = vpop.eup %2218 }
0x1196   :  { %v1370_v15 = vmul.f32 2.0, %v2219_v14  ;;  %v1372_v37 = vmul.f32 %v2219_v14, %v2664_v57 }
0x1198   :  { %v1780_v16 = vadd.f32 -1.0, %v1370_v15 }
0x119a   :  { %1374 = vrot.lane.b32.xlu1 %v1780_v16, %s2265_s28 }
0x11a8   :  { %v1260_v17 = vpop.f32.mrf.mxu0 }
0x11a9   :  { %v1261_v18 = vadd.f32 %v1260_v17, %v2449_v38 }
0x11aa   :  { %v2084_v19 = vpop.f32.mrf.mxu0 }
0x11ab   :  { %v1775_v24 = vmul.f32 -1.442695, %v1261_v18 }
0x11ad   :  { %2220 = vpow2.f32 %v1775_v24 }
0x11ba   :  { %v2221_v29 = vpop.eup %2220 }
0x11bb   :  { %v1267_v30 = vadd.f32 1.0, %v2221_v29 }
0x11bd   :  { %2222 = vrcp.f32 %v1267_v30 }
0x11ca   :  { %v2223_v31 = vpop.eup %2222 }
0x11cb   :  { %v1270_v32 = vmul.f32 2.0, %v2223_v31  ;;  %v1272_v41 = vmul.f32 %v2223_v31, %v2669_v61 }
0x11cd   :  { %v1776_v33 = vadd.f32 -1.0, %v1270_v32 }
0x11cf   :  { %1274 = vrot.lane.b32.xlu0 %v1776_v33, %s2265_s28 }
0x120c   :  { %v1375_v34 = vpop.permute.xlu1 %1374 }
0x120d   :  { %v1377_v1 = vmul.f32 %v2219_v14, %v1375_v34 }
0x120f   :  { %1379 = vrot.lane.b32.xlu1 %v1377_v1, %s2265_s28 }
0x1241   :  { %v1275_v35 = vpop.permute.xlu0 %1274 }
0x1242   :  { %v1277_v36 = vmul.f32 %v2223_v31, %v1275_v35  ;;  %v2262_v35 = vld [vmem:[%s2806_s3] sm:$0x3] }
0x1244   :  { %1279 = vrot.lane.b32.xlu0 %v1277_v36, %s2265_s28 }
0x1281   :  { %v1380_v39 = vpop.permute.xlu1 %1379 }
0x1282   :  { %v2723_v2 = vadd.f32 %v1380_v39, %v1372_v37 }
0x1284   :  { %2224 = vtanh.f32 %v2723_v2 }
0x1291   :  { %v2225_v40 = vpop.eup %2224 }
0x1292   :  { %1385 = vrot.lane.b32.xlu1 %v2225_v40, %s2265_s28 }
0x12b6   :  { %v1280_v3 = vpop.permute.xlu0 %1279 }
0x12b7   :  { %v2728_v42 = vadd.f32 %v1280_v3, %v1272_v41 }
0x12b9   :  { %2226 = vtanh.f32 %v2728_v42 }
0x12c6   :  { %v2227_v4 = vpop.eup %2226 }
0x12c7   :  { %1285 = vrot.lane.b32.xlu0 %v2227_v4, %s2265_s28 }
0x1304   :  { %v1386_v43 = vpop.permute.xlu1 %1385 }
0x1305   :  { %v1388_v44 = vmul.f32 %v2219_v14, %v1386_v43 }
0x1307   :  { %1395 = vrot.lane.b32.xlu1 %v1388_v44, %s2266_s20  ;;  %v1791_v44 = vld [vmem:[%s2807_s4] ss:$0 sm:$0xff] }
0x1339   :  { %v1286_v45 = vpop.permute.xlu0 %1285 }
0x133a   :  { %v1288_v46 = vmul.f32 %v2223_v31, %v1286_v45 }
0x133c   :  { %1390 = vrot.lane.b32.xlu0 %v1288_v46, %s2267_s25 }
0x1379   :  { %v1396_v47 = vpop.permute.xlu1 %1395 }
0x137a   :  { %2124 = vmatmul.mubr.msk.f32.vlgmr.msra.gmra.mxu0 %vm36_vm4, %v1396_v47 }
0x137b   :  { %2127 = vmatpush3.msra.mxu0 %v2254_v48  ;;  %2142 = vmatprep.mubr.msk.f32.mxu0 %vm2264_vm0, %v2263_v0 }
0x137c   :  { %2128 = vmatprep.subr.mxu0 %v2263_v0 }
0x137d   :  { %2129 = vmatpush3.msra.mxu0 %v2255_v49 }
0x137e   :  { %2130 = vmatprep.subr.mxu0 %v2263_v0 }
0x137f   :  { %2131 = vmatpush3.msra.mxu0 %v2256_v50 }
0x1380   :  { %2132 = vmatprep.subr.mxu0 %v2263_v0 }
0x1381   :  { %2133 = vmatpush3.msra.mxu0 %v2257_v51 }
0x1382   :  { %2134 = vmatprep.subr.mxu0 %v2263_v0 }
0x1383   :  { %2135 = vmatpush3.msra.mxu0 %v2258_v52 }
0x1384   :  { %2136 = vmatprep.subr.mxu0 %v2263_v0 }
0x1385   :  { %2137 = vmatpush3.msra.mxu0 %v2259_v53 }
0x1386   :  { %2138 = vmatprep.subr.mxu0 %v2263_v0 }
0x1387   :  { %2139 = vmatpush3.msra.mxu0 %v2260_v54 }
0x1388   :  { %2140 = vmatprep.subr.mxu0 %v2263_v0 }
0x1389   :  { %2141 = vmatpush3.msra.mxu0 %v2261_v55 }
0x13ae   :  { %v1391_v56 = vpop.permute.xlu0 %1390 }
0x13af   :  { %1393 = vst.msk [vmem:[#allocation2] sm:$0x3] %vm136_vm2, %v1391_v56 }
0x13b0   :  { %1398 = vst.msk [vmem:[#allocation2] sm:$0x3] %vm142_vm3, %v1396_v47 }
0x13b7   :  { %v1399_v57 = vld [vmem:[#allocation2] sm:$0x3] }
0x13b8   :  { %2113 = vmatmul.mubr.msk.f32.vlgmr.msra.gmra.mxu1 %vm145_vm5, %v1399_v57 }
0x143a   :  { %v1568_v59 = vpop.f32.mrf.mxu0 }
0x143b   :  { %v1572_v60 = vadd.f32 %v1784_v58, %v1568_v59 }
0x143c   :  { %v2125_v0 = vpop.f32.mrf.mxu0 }
0x143d   :  { %v1786_v61 = vmul.f32 -1.442695, %v1572_v60 }
0x143f   :  { %2228 = vpow2.f32 %v1786_v61 }
0x144c   :  { %v2229_v62 = vpop.eup %2228 }
0x144d   :  { %v1576_v63 = vadd.f32 1.0, %v2229_v62 }
0x144f   :  { %2230 = vrcp.f32 %v1576_v63 }
0x145c   :  { %v2231_v5 = vpop.eup %2230 }
0x145d   :  { %v1579_v6 = vmul.f32 2.0, %v2231_v5 }
0x145f   :  { %v1787_v7 = vadd.f32 -1.0, %v1579_v6 }
0x1461   :  { %1583 = vrot.lane.b32.xlu1 %v1787_v7, %s2265_s28 }
0x1478   :  { %v1469_v8 = vpop.f32.mrf.mxu1 }
0x1479   :  { %v1470_v20 = vadd.f32 %v1469_v8, %v2449_v38  ;;  %v1581_v38 = vmul.f32 %v2231_v5, %v2723_v2 }
0x147a   :  { %v2114_v21 = vpop.f32.mrf.mxu1 }
0x147b   :  { %v1782_v22 = vmul.f32 -1.442695, %v1470_v20 }
0x147d   :  { %2232 = vpow2.f32 %v1782_v22 }
0x148a   :  { %v2233_v23 = vpop.eup %2232 }
0x148b   :  { %v1476_v25 = vadd.f32 1.0, %v2233_v23 }
0x148d   :  { %2234 = vrcp.f32 %v1476_v25 }
0x149a   :  { %v2235_v26 = vpop.eup %2234 }
0x149b   :  { %v1479_v27 = vmul.f32 2.0, %v2235_v26  ;;  %v1481_v16 = vmul.f32 %v2235_v26, %v2728_v42 }
0x149d   :  { %v1783_v28 = vadd.f32 -1.0, %v1479_v27 }
0x149f   :  { %1483 = vrot.lane.b32.xlu0 %v1783_v28, %s2265_s28 }
0x14d3   :  { %v1584_v9 = vpop.permute.xlu1 %1583 }
0x14d4   :  { %v1586_v10 = vmul.f32 %v2231_v5, %v1584_v9 }
0x14d6   :  { %1588 = vrot.lane.b32.xlu1 %v1586_v10, %s2265_s28 }
0x1511   :  { %v1484_v11 = vpop.permute.xlu0 %1483 }
0x1512   :  { %v1486_v12 = vmul.f32 %v2235_v26, %v1484_v11 }
0x1514   :  { %1488 = vrot.lane.b32.xlu0 %v1486_v12, %s2265_s28 }
0x1548   :  { %v1589_v13 = vpop.permute.xlu1 %1588 }
0x1549   :  { %v1591_v14 = vadd.f32 %v1589_v13, %v1581_v38 }
0x154b   :  { %2236 = vtanh.f32 %v1591_v14 }
0x1558   :  { %v2237_v15 = vpop.eup %2236 }
0x1559   :  { %1594 = vrot.lane.b32.xlu1 %v2237_v15, %s2265_s28 }
0x1586   :  { %v1489_v17 = vpop.permute.xlu0 %1488 }
0x1587   :  { %v1491_v18 = vadd.f32 %v1489_v17, %v1481_v16 }
0x1589   :  { %2238 = vtanh.f32 %v1491_v18 }
0x1596   :  { %v2239_v19 = vpop.eup %2238 }
0x1597   :  { %1494 = vrot.lane.b32.xlu0 %v2239_v19, %s2265_s28 }
0x15cb   :  { %v1595_v24 = vpop.permute.xlu1 %1594 }
0x15cc   :  { %v1597_v29 = vmul.f32 %v2231_v5, %v1595_v24 }
0x15ce   :  { %1604 = vrot.lane.b32.xlu1 %v1597_v29, %s2266_s20 }
0x1609   :  { %v1495_v30 = vpop.permute.xlu0 %1494 }
0x160a   :  { %v1497_v31 = vmul.f32 %v2235_v26, %v1495_v30 }
0x160c   :  { %1599 = vrot.lane.b32.xlu0 %v1497_v31, %s2267_s25 }
0x1640   :  { %v1605_v33 = vpop.permute.xlu1 %1604 }
0x167e   :  { %v1600_v32 = vpop.permute.xlu0 %1599 }
0x167f   :  { %1602 = vst.msk [vmem:[#allocation2] sm:$0x3] %vm136_vm2, %v1600_v32 }
0x1680   :  { %1607 = vst.msk [vmem:[#allocation2] sm:$0x3] %vm142_vm3, %v1605_v33 }
0x1687   :  { %v1608_v34 = vld [vmem:[#allocation2] sm:$0x3] }
0x1688   :  { %2143 = vmatmul.mubr.msk.f32.vlgmr.msra.gmra.mxu0 %vm145_vm5, %v1608_v34 }
0x1748   :  { %v1678_v1 = vpop.f32.mrf.mxu0 }
0x1749   :  { %v1679_v36 = vadd.f32 %v2262_v35, %v1678_v1 }
0x174a   :  { %v2144_v37 = vpop.f32.mrf.mxu0 }
0x174b   :  { %v1789_v39 = vmul.f32 -1.442695, %v1679_v36 }
0x174d   :  { %2240 = vpow2.f32 %v1789_v39 }
0x175a   :  { %v2241_v2 = vpop.eup %2240 }
0x175b   :  { %v1685_v40 = vadd.f32 1.0, %v2241_v2 }
0x175d   :  { %2242 = vrcp.f32 %v1685_v40 }
0x176a   :  { %v2243_v41 = vpop.eup %2242 }
0x176b   :  { %v1688_v3 = vmul.f32 2.0, %v2243_v41  ;;  %v1690_v45 = vmul.f32 %v2243_v41, %v1491_v18 }
0x176d   :  { %v1790_v42 = vadd.f32 -1.0, %v1688_v3 }
0x176f   :  { %1692 = vrot.lane.b32.xlu0 %v1790_v42, %s2265_s28 }
0x17e1   :  { %v1693_v4 = vpop.permute.xlu0 %1692 }
0x17e2   :  { %v1695_v43 = vmul.f32 %v2243_v41, %v1693_v4 }
0x17e4   :  { %1697 = vrot.lane.b32.xlu1 %v1695_v43, %s2265_s28 }
0x17e8   :  { %1714 = vrot.lane.b32.xlu1 %v1791_v44, %s2266_s20 }
0x1856   :  { %v1698_v46 = vpop.permute.xlu1 %1697 }
0x1857   :  { %v1700_v47 = vadd.f32 %v1698_v46, %v1690_v45 }
0x1859   :  { %2244 = vtanh.f32 %v1700_v47 }
0x185a   :  { %v1715_v51 = vpop.permute.xlu1 %1714 }
0x1866   :  { %v2245_v48 = vpop.eup %2244 }
0x1867   :  { %1703 = vrot.lane.b32.xlu0 %v2245_v48, %s2265_s28 }
0x18d9   :  { %v1704_v49 = vpop.permute.xlu0 %1703 }
0x18da   :  { %v1706_v50 = vmul.f32 %v2243_v41, %v1704_v49 }
0x18dc   :  { %v1707_v52 = vmax.f32 %v1706_v50, 0.0 }
0x18de   :  { %v1717_v53 = vmul.f32 %v1715_v51, %v1707_v52 }
0x18e0   :  { %1719 = vrot.lane.b32.xlu0 %v1717_v53, %s2266_s20 }
0x1952   :  { %v1720_v54 = vpop.permute.xlu0 %1719 }
0x1953   :  { %v1722_v55 = vsel %vm142_vm3, %v1720_v54, 0.0 }
0x1954   :  { %1723 = vadd.xlane.f32.xlu1 %v1722_v55 }
0x19dd   :  { %v1724_v56 = vpop.xlane.xlu1 %1723 }
0x19de   :  { %v1792_v57 = vmul.f32 -1.442695, %v1724_v56 }
0x19e0   :  { %2246 = vpow2.f32 %v1792_v57 }
0x19ed   :  { %v2247_v58 = vpop.eup %2246 }
0x19ee   :  { %v1728_v59 = vadd.f32 1.0, %v2247_v58 }
0x19f0   :  { %2248 = vrcp.f32 %v1728_v59 }
0x19fd   :  { %v2249_v60 = vpop.eup %2248 }
0x19fe   :  { %1732 = vst.msk [vmem:[%s2808_s5] sm:$0x3] %vm1731_vm6, %v2249_v60 }

</bundles_post_ra>
